<compile_context>
chip_gen: v6e
topology: v6e:2x2x1
jax: 0.10.0
libtpu: 0.0.40
codegen_flags: <defaults>
</compile_context>

<pallas_src>
import functools

import jax
import jax.numpy as jnp
from jax.experimental import pallas as pl
from jax.experimental.pallas import tpu as pltpu


# ----------------------------------------------------------------------------
# Fused kernel: bidirectional LSTM scan + bag/cumulative feature assembly +
# FullyConnectedStack classifier, all in one invocation (no grid).
#
# Combined "gate-major" lane layout (H = d_hid, widths of H lanes each):
#   [ i_fwd | i_bwd | f_fwd | f_bwd | g_fwd | g_bwd | o_fwd | o_bwd ]   (8H lanes)
# Hidden / cell state carried as (1, 2H) = [ h_fwd | h_bwd ].
# whh_comb is block-diagonal: rows 0:H act only on *_fwd columns, rows H:2H
# only on *_bwd columns, so one matmul advances both directions.
# ----------------------------------------------------------------------------
def _fused_forward_kernel(x_ref, wihf_ref, wihb_ref, bias_ref, whh_ref,
                          h0_ref, c0_ref, w1_ref, b1_ref, w2_ref, b2_ref,
                          out_ref):
    T = x_ref.shape[0]
    H = whh_ref.shape[0] // 2          # hidden size per direction
    f32 = jnp.float32

    x = x_ref[...]

    # Input->gate projections for every timestep, both directions: one MXU
    # matmul each, off the recurrence critical path.  Row t of xg_f is the
    # forward contribution for time t; row t of xg_b is the backward
    # contribution for input x_t (consumed at step T-1-t).  Bias folded once.
    xg_f = jnp.dot(x, wihf_ref[...], preferred_element_type=f32) + bias_ref[...]
    xg_b = jnp.dot(x, wihb_ref[...], preferred_element_type=f32)

    whh = whh_ref[...]                 # (2H, 8H) block-diagonal recurrent weight
    h = h0_ref[...].astype(f32)        # (1, 2H) = [h_fwd | h_bwd]
    c = c0_ref[...].astype(f32)        # (1, 2H)

    hs = []
    # Fully-unrolled recurrence (PyTorch gate order i, f, g, o):
    #   c = f*c + i*g ;  h = o*tanh(c)
    for t in range(T):
        g = (xg_f[t:t + 1, :] + xg_b[T - 1 - t:T - t, :]
             + jnp.dot(h, whh, preferred_element_type=f32))       # (1, 8H)
        ifg = jax.nn.sigmoid(g[:, 0:4 * H])                       # [i_f i_b f_f f_b]
        gg = jnp.tanh(g[:, 4 * H:6 * H])                          # [g_f g_b]
        o = jax.nn.sigmoid(g[:, 6 * H:8 * H])                     # [o_f o_b]
        c = ifg[:, 2 * H:4 * H] * c + ifg[:, 0:2 * H] * gg
        h = o * jnp.tanh(c)                                       # (1, 2H)
        hs.append(h)
        # hs[t][:, :H]  = forward hidden at time t
        # hs[t][:, H:]  = backward hidden at position T-1-t

    # Classifier input (T+1, 2H), assembled in registers:
    #   row p (p < T): [fwd hidden at time p | bwd hidden at position p]
    #   row T        : bag embedding = [fwd final | bwd final] == hs[T-1]
    rows = [jnp.concatenate([hs[p][:, :H], hs[T - 1 - p][:, H:]], axis=1)
            for p in range(T)]
    rows.append(hs[T - 1])
    feats = jnp.concatenate(rows, axis=0)                          # (T+1, 2H)

    # FullyConnectedStack (eval): Linear -> ReLU -> Linear (dropout = identity,
    # final activation = None).  Output is lane-padded to 128 for a dense store.
    hid = jnp.dot(feats, w1_ref[...], preferred_element_type=f32) + b1_ref[...]
    hid = jnp.maximum(hid, 0.0)
    y = jnp.dot(hid, w2_ref[...], preferred_element_type=f32) + b2_ref[...]
    out_ref[...] = y.astype(out_ref.dtype)


def _fused_call(x, fp):
    T = x.shape[0]
    lane_pad = fp["cls_w2p"].shape[1]
    vmem = pl.BlockSpec(memory_space=pltpu.MemorySpace.VMEM)
    return pl.pallas_call(
        _fused_forward_kernel,
        out_shape=jax.ShapeDtypeStruct((T + 1, lane_pad), jnp.float32),
        in_specs=[vmem] * 11,
        out_specs=vmem,
    )(x, fp["wih_comb_f"], fp["wih_comb_b"], fp["bias_comb"], fp["whh_comb"],
      fp["h0"], fp["c0"], fp["cls_w1"], fp["cls_b1"], fp["cls_w2p"], fp["cls_b2p"])


# ----------------------------------------------------------------------------
# Full forward: LstmEmbeddingSpaceAggregator.forward (eval mode)
# ----------------------------------------------------------------------------
@functools.partial(jax.jit, static_argnames=("n_classes",))
def aggregator_forward(instance_embeddings, fused_params, *, n_classes):
    T = instance_embeddings.shape[0]
    out = _fused_call(instance_embeddings, fused_params)          # (T+1, 128)
    bag_prediction = out[T:T + 1, :n_classes]                     # (1, C)
    # classifier_activation_func is None -> no post-activation.
    cumulative_predictions = out[:T, :n_classes][None]            # (1, T, C)
    return bag_prediction, cumulative_predictions


# ----------------------------------------------------------------------------
# One-time weight-layout preparation (host side, pure JAX, run once).
# Raw params use PyTorch conventions: Wih^T (Din,4H), Whh^T (H,4H), gate order
# [i f g o]; bias = b_ih + b_hh.
# ----------------------------------------------------------------------------
def _interleave_gates(a_f, a_b, H):
    """[i f g o] blocks of two directions -> gate-major [i_f i_b f_f f_b g_f g_b o_f o_b]."""
    parts = []
    for k in range(4):
        parts.append(a_f[..., k * H:(k + 1) * H])
        parts.append(a_b[..., k * H:(k + 1) * H])
    return jnp.concatenate(parts, axis=-1)


def prepare_fused_params(p, d_hid):
    H = d_hid
    z_ih = jnp.zeros_like(p["wih_f"])
    z_hh = jnp.zeros_like(p["whh_f"])
    fp = {}
    fp["wih_comb_f"] = _interleave_gates(p["wih_f"], z_ih, H)            # (Din, 8H)
    fp["wih_comb_b"] = _interleave_gates(z_ih, p["wih_b"], H)            # (Din, 8H)
    fp["bias_comb"] = _interleave_gates(p["b_f"], p["b_b"], H)           # (1, 8H)
    whh_top = _interleave_gates(p["whh_f"], z_hh, H)                     # (H, 8H)
    whh_bot = _interleave_gates(z_hh, p["whh_b"], H)                     # (H, 8H)
    fp["whh_comb"] = jnp.concatenate([whh_top, whh_bot], axis=0)         # (2H, 8H)
    fp["h0"] = jnp.concatenate([p["h0_f"], p["h0_b"]], axis=1)           # (1, 2H)
    fp["c0"] = jnp.concatenate([p["c0_f"], p["c0_b"]], axis=1)           # (1, 2H)
    fp["cls_w1"] = p["cls_w1"]
    fp["cls_b1"] = p["cls_b1"]
    C = p["cls_w2"].shape[1]
    lane_pad = ((C + 127) // 128) * 128
    fp["cls_w2p"] = jnp.pad(p["cls_w2"], ((0, 0), (0, lane_pad - C)))    # (Dh, 128)
    fp["cls_b2p"] = jnp.pad(p["cls_b2"], ((0, 0), (0, lane_pad - C)))    # (1, 128)
    return jax.tree_util.tree_map(lambda a: jnp.asarray(a, jnp.float32), fp)


# ----------------------------------------------------------------------------
# Deterministic parameter construction (PyTorch-style uniform(-1/sqrt(H), 1/sqrt(H)))
# ----------------------------------------------------------------------------
def make_params(key, d_in, d_hid, ds_hid, n_classes):
    H = d_hid
    k_lstm = 1.0 / jnp.sqrt(jnp.float32(H))
    keys = jax.random.split(key, 12)

    def uni(k, shape, bound):
        return jax.random.uniform(k, shape, jnp.float32, -bound, bound)

    params = {}
    params["wih_f"] = uni(keys[0], (d_in, 4 * H), k_lstm)   # Wih^T
    params["whh_f"] = uni(keys[1], (H, 4 * H), k_lstm)      # Whh^T
    params["b_f"] = uni(keys[2], (1, 4 * H), k_lstm) + uni(keys[3], (1, 4 * H), k_lstm)
    params["wih_b"] = uni(keys[4], (d_in, 4 * H), k_lstm)
    params["whh_b"] = uni(keys[5], (H, 4 * H), k_lstm)
    params["b_b"] = uni(keys[6], (1, 4 * H), k_lstm) + uni(keys[7], (1, 4 * H), k_lstm)
    # init_hidden / init_cell: torch.zeros in the module's __init__
    params["h0_f"] = jnp.zeros((1, H), jnp.float32)
    params["c0_f"] = jnp.zeros((1, H), jnp.float32)
    params["h0_b"] = jnp.zeros((1, H), jnp.float32)
    params["c0_b"] = jnp.zeros((1, H), jnp.float32)

    E, Dh = 2 * H, ds_hid[0]
    k1 = 1.0 / jnp.sqrt(jnp.float32(E))
    k2 = 1.0 / jnp.sqrt(jnp.float32(Dh))
    params["cls_w1"] = uni(keys[8], (E, Dh), k1)
    params["cls_b1"] = uni(keys[9], (1, Dh), k1)
    params["cls_w2"] = uni(keys[10], (Dh, n_classes), k2)
    params["cls_b2"] = uni(keys[11], (1, n_classes), k2)
    return params


# ----------------------------------------------------------------------------
# Pure-JAX reference (per-direction scan, PyTorch conventions) for validation.
# ----------------------------------------------------------------------------
def _reference_forward(x, p, H):
    def cell(h, c, xg, whh_t):
        g = xg + h @ whh_t
        i = jax.nn.sigmoid(g[:, 0 * H:1 * H])
        f = jax.nn.sigmoid(g[:, 1 * H:2 * H])
        gg = jnp.tanh(g[:, 2 * H:3 * H])
        o = jax.nn.sigmoid(g[:, 3 * H:4 * H])
        c = f * c + i * gg
        return o * jnp.tanh(c), c

    T = x.shape[0]
    xg_f = x @ p["wih_f"] + p["b_f"]
    xg_b = x @ p["wih_b"] + p["b_b"]
    h_f, c_f = p["h0_f"], p["c0_f"]
    h_b, c_b = p["h0_b"], p["c0_b"]
    outs_f, outs_b = [], [None] * T
    for t in range(T):
        h_f, c_f = cell(h_f, c_f, xg_f[t:t + 1], p["whh_f"])
        outs_f.append(h_f)
        tb = T - 1 - t
        h_b, c_b = cell(h_b, c_b, xg_b[tb:tb + 1], p["whh_b"])
        outs_b[tb] = h_b
    out = jnp.concatenate([jnp.concatenate(outs_f, 0),
                           jnp.concatenate(outs_b, 0)], axis=1)     # (T, 2H)
    bag = jnp.concatenate([h_f, h_b], axis=1)                       # (1, 2H)

    def mlp(z):
        return jnp.maximum(z @ p["cls_w1"] + p["cls_b1"], 0.0) @ p["cls_w2"] + p["cls_b2"]

    return mlp(bag), mlp(out)[None]


if __name__ == "__main__":
    d_in, d_hid = 16, 32
    ds_hid, n_classes = (64,), 4
    n_instances = 8

    key = jax.random.PRNGKey(0)
    k_x, k_p = jax.random.split(key)
    instance_embeddings = jax.random.normal(k_x, (n_instances, d_in), jnp.float32)
    raw_params = make_params(k_p, d_in, d_hid, ds_hid, n_classes)
    fused_params = prepare_fused_params(raw_params, d_hid)

    bag_pred, cum_preds = aggregator_forward(instance_embeddings, fused_params,
                                             n_classes=n_classes)
    jax.block_until_ready((bag_pred, cum_preds))

    assert bag_pred.shape == (1, n_classes)
    assert cum_preds.shape == (1, n_instances, n_classes)

    # Validate against the pure-JAX reference (loose tolerance: TPU matmul
    # default precision uses bf16 passes, and accumulation order differs).
    ref_bag, ref_cum = _reference_forward(instance_embeddings, raw_params, d_hid)
    assert jnp.allclose(bag_pred, ref_bag, atol=5e-2, rtol=5e-2), (bag_pred, ref_bag)
    assert jnp.allclose(cum_preds, ref_cum, atol=5e-2, rtol=5e-2)

    print("KERNEL_OK")
</pallas_src>

<mosaic_0001>
module attributes {stable_mosaic.version = 11 : i64} {
  func.func @_fused_forward_kernel(%arg0: memref<8x16xf32, #tpu.memory_space<vmem>>, %arg1: memref<16x256xf32, #tpu.memory_space<vmem>>, %arg2: memref<16x256xf32, #tpu.memory_space<vmem>>, %arg3: memref<1x256xf32, #tpu.memory_space<vmem>>, %arg4: memref<64x256xf32, #tpu.memory_space<vmem>>, %arg5: memref<1x64xf32, #tpu.memory_space<vmem>>, %arg6: memref<1x64xf32, #tpu.memory_space<vmem>>, %arg7: memref<64x64xf32, #tpu.memory_space<vmem>>, %arg8: memref<1x64xf32, #tpu.memory_space<vmem>>, %arg9: memref<64x128xf32, #tpu.memory_space<vmem>>, %arg10: memref<1x128xf32, #tpu.memory_space<vmem>>, %arg11: memref<9x128xf32, #tpu.memory_space<vmem>>) attributes {dimension_semantics = [], scalar_prefetch = 0 : i64, scratch_operands = 0 : i64, tpu.core_type = #tpu.core_type<tc>} {
    %c0 = arith.constant 0 : index
    %c0_0 = arith.constant 0 : index
    %0 = vector.load %arg0[%c0, %c0_0] : memref<8x16xf32, #tpu.memory_space<vmem>>, vector<8x16xf32>
    %c0_1 = arith.constant 0 : index
    %c0_2 = arith.constant 0 : index
    %1 = vector.load %arg1[%c0_1, %c0_2] : memref<16x256xf32, #tpu.memory_space<vmem>>, vector<16x256xf32>
    %cst = arith.constant dense<0.000000e+00> : vector<8x256xf32>
    %2 = tpu.matmul %0, %1, %cst {dimension_numbers = #tpu.dot_dimension_numbers<[1], [0], [0], [1], [0, 0, 1, 1], [], []>} : vector<8x16xf32>, vector<16x256xf32>, vector<8x256xf32> -> vector<8x256xf32>
    %c0_3 = arith.constant 0 : index
    %c0_4 = arith.constant 0 : index
    %3 = vector.load %arg3[%c0_3, %c0_4] : memref<1x256xf32, #tpu.memory_space<vmem>>, vector<1x256xf32>
    %4 = vector.broadcast %3 : vector<1x256xf32> to vector<8x256xf32>
    %5 = arith.addf %2, %4 : vector<8x256xf32>
    %c0_5 = arith.constant 0 : index
    %c0_6 = arith.constant 0 : index
    %6 = vector.load %arg2[%c0_5, %c0_6] : memref<16x256xf32, #tpu.memory_space<vmem>>, vector<16x256xf32>
    %cst_7 = arith.constant dense<0.000000e+00> : vector<8x256xf32>
    %7 = tpu.matmul %0, %6, %cst_7 {dimension_numbers = #tpu.dot_dimension_numbers<[1], [0], [0], [1], [0, 0, 1, 1], [], []>} : vector<8x16xf32>, vector<16x256xf32>, vector<8x256xf32> -> vector<8x256xf32>
    %c0_8 = arith.constant 0 : index
    %c0_9 = arith.constant 0 : index
    %8 = vector.load %arg4[%c0_8, %c0_9] : memref<64x256xf32, #tpu.memory_space<vmem>>, vector<64x256xf32>
    %c0_10 = arith.constant 0 : index
    %c0_11 = arith.constant 0 : index
    %9 = vector.load %arg5[%c0_10, %c0_11] : memref<1x64xf32, #tpu.memory_space<vmem>>, vector<1x64xf32>
    %c0_12 = arith.constant 0 : index
    %c0_13 = arith.constant 0 : index
    %10 = vector.load %arg6[%c0_12, %c0_13] : memref<1x64xf32, #tpu.memory_space<vmem>>, vector<1x64xf32>
    %11 = vector.extract_strided_slice %5 {offsets = [0, 0], sizes = [1, 256], strides = [1, 1]} : vector<8x256xf32> to vector<1x256xf32>
    %12 = vector.extract_strided_slice %7 {offsets = [7, 0], sizes = [1, 256], strides = [1, 1]} : vector<8x256xf32> to vector<1x256xf32>
    %13 = arith.addf %11, %12 : vector<1x256xf32>
    %cst_14 = arith.constant dense<0.000000e+00> : vector<1x256xf32>
    %14 = tpu.matmul %9, %8, %cst_14 {dimension_numbers = #tpu.dot_dimension_numbers<[1], [0], [0], [1], [0, 0, 1, 1], [], []>} : vector<1x64xf32>, vector<64x256xf32>, vector<1x256xf32> -> vector<1x256xf32>
    %15 = arith.addf %13, %14 : vector<1x256xf32>
    %16 = vector.extract_strided_slice %15 {offsets = [0, 0], sizes = [1, 128], strides = [1, 1]} : vector<1x256xf32> to vector<1x128xf32>
    %17 = arith.negf %16 : vector<1x128xf32>
    %18 = math.exp %17 : vector<1x128xf32>
    %cst_15 = arith.constant 1.000000e+00 : f32
    %19 = vector.broadcast %cst_15 : f32 to vector<1x128xf32>
    %20 = arith.addf %19, %18 : vector<1x128xf32>
    %21 = arith.divf %19, %20 : vector<1x128xf32>
    %22 = vector.extract_strided_slice %15 {offsets = [0, 128], sizes = [1, 64], strides = [1, 1]} : vector<1x256xf32> to vector<1x64xf32>
    %23 = math.tanh %22 : vector<1x64xf32>
    %24 = vector.extract_strided_slice %15 {offsets = [0, 192], sizes = [1, 64], strides = [1, 1]} : vector<1x256xf32> to vector<1x64xf32>
    %25 = arith.negf %24 : vector<1x64xf32>
    %26 = math.exp %25 : vector<1x64xf32>
    %cst_16 = arith.constant 1.000000e+00 : f32
    %27 = vector.broadcast %cst_16 : f32 to vector<1x64xf32>
    %28 = arith.addf %27, %26 : vector<1x64xf32>
    %29 = arith.divf %27, %28 : vector<1x64xf32>
    %30 = vector.extract_strided_slice %21 {offsets = [0, 64], sizes = [1, 64], strides = [1, 1]} : vector<1x128xf32> to vector<1x64xf32>
    %31 = arith.mulf %30, %10 : vector<1x64xf32>
    %32 = vector.extract_strided_slice %21 {offsets = [0, 0], sizes = [1, 64], strides = [1, 1]} : vector<1x128xf32> to vector<1x64xf32>
    %33 = arith.mulf %32, %23 : vector<1x64xf32>
    %34 = arith.addf %31, %33 : vector<1x64xf32>
    %35 = math.tanh %34 : vector<1x64xf32>
    %36 = arith.mulf %29, %35 : vector<1x64xf32>
    %37 = vector.extract_strided_slice %5 {offsets = [1, 0], sizes = [1, 256], strides = [1, 1]} : vector<8x256xf32> to vector<1x256xf32>
    %38 = vector.extract_strided_slice %7 {offsets = [6, 0], sizes = [1, 256], strides = [1, 1]} : vector<8x256xf32> to vector<1x256xf32>
    %39 = arith.addf %37, %38 : vector<1x256xf32>
    %cst_17 = arith.constant dense<0.000000e+00> : vector<1x256xf32>
    %40 = tpu.matmul %36, %8, %cst_17 {dimension_numbers = #tpu.dot_dimension_numbers<[1], [0], [0], [1], [0, 0, 1, 1], [], []>} : vector<1x64xf32>, vector<64x256xf32>, vector<1x256xf32> -> vector<1x256xf32>
    %41 = arith.addf %39, %40 : vector<1x256xf32>
    %42 = vector.extract_strided_slice %41 {offsets = [0, 0], sizes = [1, 128], strides = [1, 1]} : vector<1x256xf32> to vector<1x128xf32>
    %43 = arith.negf %42 : vector<1x128xf32>
    %44 = math.exp %43 : vector<1x128xf32>
    %cst_18 = arith.constant 1.000000e+00 : f32
    %45 = vector.broadcast %cst_18 : f32 to vector<1x128xf32>
    %46 = arith.addf %45, %44 : vector<1x128xf32>
    %47 = arith.divf %45, %46 : vector<1x128xf32>
    %48 = vector.extract_strided_slice %41 {offsets = [0, 128], sizes = [1, 64], strides = [1, 1]} : vector<1x256xf32> to vector<1x64xf32>
    %49 = math.tanh %48 : vector<1x64xf32>
    %50 = vector.extract_strided_slice %41 {offsets = [0, 192], sizes = [1, 64], strides = [1, 1]} : vector<1x256xf32> to vector<1x64xf32>
    %51 = arith.negf %50 : vector<1x64xf32>
    %52 = math.exp %51 : vector<1x64xf32>
    %cst_19 = arith.constant 1.000000e+00 : f32
    %53 = vector.broadcast %cst_19 : f32 to vector<1x64xf32>
    %54 = arith.addf %53, %52 : vector<1x64xf32>
    %55 = arith.divf %53, %54 : vector<1x64xf32>
    %56 = vector.extract_strided_slice %47 {offsets = [0, 64], sizes = [1, 64], strides = [1, 1]} : vector<1x128xf32> to vector<1x64xf32>
    %57 = arith.mulf %56, %34 : vector<1x64xf32>
    %58 = vector.extract_strided_slice %47 {offsets = [0, 0], sizes = [1, 64], strides = [1, 1]} : vector<1x128xf32> to vector<1x64xf32>
    %59 = arith.mulf %58, %49 : vector<1x64xf32>
    %60 = arith.addf %57, %59 : vector<1x64xf32>
    %61 = math.tanh %60 : vector<1x64xf32>
    %62 = arith.mulf %55, %61 : vector<1x64xf32>
    %63 = vector.extract_strided_slice %5 {offsets = [2, 0], sizes = [1, 256], strides = [1, 1]} : vector<8x256xf32> to vector<1x256xf32>
    %64 = vector.extract_strided_slice %7 {offsets = [5, 0], sizes = [1, 256], strides = [1, 1]} : vector<8x256xf32> to vector<1x256xf32>
    %65 = arith.addf %63, %64 : vector<1x256xf32>
    %cst_20 = arith.constant dense<0.000000e+00> : vector<1x256xf32>
    %66 = tpu.matmul %62, %8, %cst_20 {dimension_numbers = #tpu.dot_dimension_numbers<[1], [0], [0], [1], [0, 0, 1, 1], [], []>} : vector<1x64xf32>, vector<64x256xf32>, vector<1x256xf32> -> vector<1x256xf32>
    %67 = arith.addf %65, %66 : vector<1x256xf32>
    %68 = vector.extract_strided_slice %67 {offsets = [0, 0], sizes = [1, 128], strides = [1, 1]} : vector<1x256xf32> to vector<1x128xf32>
    %69 = arith.negf %68 : vector<1x128xf32>
    %70 = math.exp %69 : vector<1x128xf32>
    %cst_21 = arith.constant 1.000000e+00 : f32
    %71 = vector.broadcast %cst_21 : f32 to vector<1x128xf32>
    %72 = arith.addf %71, %70 : vector<1x128xf32>
    %73 = arith.divf %71, %72 : vector<1x128xf32>
    %74 = vector.extract_strided_slice %67 {offsets = [0, 128], sizes = [1, 64], strides = [1, 1]} : vector<1x256xf32> to vector<1x64xf32>
    %75 = math.tanh %74 : vector<1x64xf32>
    %76 = vector.extract_strided_slice %67 {offsets = [0, 192], sizes = [1, 64], strides = [1, 1]} : vector<1x256xf32> to vector<1x64xf32>
    %77 = arith.negf %76 : vector<1x64xf32>
    %78 = math.exp %77 : vector<1x64xf32>
    %cst_22 = arith.constant 1.000000e+00 : f32
    %79 = vector.broadcast %cst_22 : f32 to vector<1x64xf32>
    %80 = arith.addf %79, %78 : vector<1x64xf32>
    %81 = arith.divf %79, %80 : vector<1x64xf32>
    %82 = vector.extract_strided_slice %73 {offsets = [0, 64], sizes = [1, 64], strides = [1, 1]} : vector<1x128xf32> to vector<1x64xf32>
    %83 = arith.mulf %82, %60 : vector<1x64xf32>
    %84 = vector.extract_strided_slice %73 {offsets = [0, 0], sizes = [1, 64], strides = [1, 1]} : vector<1x128xf32> to vector<1x64xf32>
    %85 = arith.mulf %84, %75 : vector<1x64xf32>
    %86 = arith.addf %83, %85 : vector<1x64xf32>
    %87 = math.tanh %86 : vector<1x64xf32>
    %88 = arith.mulf %81, %87 : vector<1x64xf32>
    %89 = vector.extract_strided_slice %5 {offsets = [3, 0], sizes = [1, 256], strides = [1, 1]} : vector<8x256xf32> to vector<1x256xf32>
    %90 = vector.extract_strided_slice %7 {offsets = [4, 0], sizes = [1, 256], strides = [1, 1]} : vector<8x256xf32> to vector<1x256xf32>
    %91 = arith.addf %89, %90 : vector<1x256xf32>
    %cst_23 = arith.constant dense<0.000000e+00> : vector<1x256xf32>
    %92 = tpu.matmul %88, %8, %cst_23 {dimension_numbers = #tpu.dot_dimension_numbers<[1], [0], [0], [1], [0, 0, 1, 1], [], []>} : vector<1x64xf32>, vector<64x256xf32>, vector<1x256xf32> -> vector<1x256xf32>
    %93 = arith.addf %91, %92 : vector<1x256xf32>
    %94 = vector.extract_strided_slice %93 {offsets = [0, 0], sizes = [1, 128], strides = [1, 1]} : vector<1x256xf32> to vector<1x128xf32>
    %95 = arith.negf %94 : vector<1x128xf32>
    %96 = math.exp %95 : vector<1x128xf32>
    %cst_24 = arith.constant 1.000000e+00 : f32
    %97 = vector.broadcast %cst_24 : f32 to vector<1x128xf32>
    %98 = arith.addf %97, %96 : vector<1x128xf32>
    %99 = arith.divf %97, %98 : vector<1x128xf32>
    %100 = vector.extract_strided_slice %93 {offsets = [0, 128], sizes = [1, 64], strides = [1, 1]} : vector<1x256xf32> to vector<1x64xf32>
    %101 = math.tanh %100 : vector<1x64xf32>
    %102 = vector.extract_strided_slice %93 {offsets = [0, 192], sizes = [1, 64], strides = [1, 1]} : vector<1x256xf32> to vector<1x64xf32>
    %103 = arith.negf %102 : vector<1x64xf32>
    %104 = math.exp %103 : vector<1x64xf32>
    %cst_25 = arith.constant 1.000000e+00 : f32
    %105 = vector.broadcast %cst_25 : f32 to vector<1x64xf32>
    %106 = arith.addf %105, %104 : vector<1x64xf32>
    %107 = arith.divf %105, %106 : vector<1x64xf32>
    %108 = vector.extract_strided_slice %99 {offsets = [0, 64], sizes = [1, 64], strides = [1, 1]} : vector<1x128xf32> to vector<1x64xf32>
    %109 = arith.mulf %108, %86 : vector<1x64xf32>
    %110 = vector.extract_strided_slice %99 {offsets = [0, 0], sizes = [1, 64], strides = [1, 1]} : vector<1x128xf32> to vector<1x64xf32>
    %111 = arith.mulf %110, %101 : vector<1x64xf32>
    %112 = arith.addf %109, %111 : vector<1x64xf32>
    %113 = math.tanh %112 : vector<1x64xf32>
    %114 = arith.mulf %107, %113 : vector<1x64xf32>
    %115 = vector.extract_strided_slice %5 {offsets = [4, 0], sizes = [1, 256], strides = [1, 1]} : vector<8x256xf32> to vector<1x256xf32>
    %116 = vector.extract_strided_slice %7 {offsets = [3, 0], sizes = [1, 256], strides = [1, 1]} : vector<8x256xf32> to vector<1x256xf32>
    %117 = arith.addf %115, %116 : vector<1x256xf32>
    %cst_26 = arith.constant dense<0.000000e+00> : vector<1x256xf32>
    %118 = tpu.matmul %114, %8, %cst_26 {dimension_numbers = #tpu.dot_dimension_numbers<[1], [0], [0], [1], [0, 0, 1, 1], [], []>} : vector<1x64xf32>, vector<64x256xf32>, vector<1x256xf32> -> vector<1x256xf32>
    %119 = arith.addf %117, %118 : vector<1x256xf32>
    %120 = vector.extract_strided_slice %119 {offsets = [0, 0], sizes = [1, 128], strides = [1, 1]} : vector<1x256xf32> to vector<1x128xf32>
    %121 = arith.negf %120 : vector<1x128xf32>
    %122 = math.exp %121 : vector<1x128xf32>
    %cst_27 = arith.constant 1.000000e+00 : f32
    %123 = vector.broadcast %cst_27 : f32 to vector<1x128xf32>
    %124 = arith.addf %123, %122 : vector<1x128xf32>
    %125 = arith.divf %123, %124 : vector<1x128xf32>
    %126 = vector.extract_strided_slice %119 {offsets = [0, 128], sizes = [1, 64], strides = [1, 1]} : vector<1x256xf32> to vector<1x64xf32>
    %127 = math.tanh %126 : vector<1x64xf32>
    %128 = vector.extract_strided_slice %119 {offsets = [0, 192], sizes = [1, 64], strides = [1, 1]} : vector<1x256xf32> to vector<1x64xf32>
    %129 = arith.negf %128 : vector<1x64xf32>
    %130 = math.exp %129 : vector<1x64xf32>
    %cst_28 = arith.constant 1.000000e+00 : f32
    %131 = vector.broadcast %cst_28 : f32 to vector<1x64xf32>
    %132 = arith.addf %131, %130 : vector<1x64xf32>
    %133 = arith.divf %131, %132 : vector<1x64xf32>
    %134 = vector.extract_strided_slice %125 {offsets = [0, 64], sizes = [1, 64], strides = [1, 1]} : vector<1x128xf32> to vector<1x64xf32>
    %135 = arith.mulf %134, %112 : vector<1x64xf32>
    %136 = vector.extract_strided_slice %125 {offsets = [0, 0], sizes = [1, 64], strides = [1, 1]} : vector<1x128xf32> to vector<1x64xf32>
    %137 = arith.mulf %136, %127 : vector<1x64xf32>
    %138 = arith.addf %135, %137 : vector<1x64xf32>
    %139 = math.tanh %138 : vector<1x64xf32>
    %140 = arith.mulf %133, %139 : vector<1x64xf32>
    %141 = vector.extract_strided_slice %5 {offsets = [5, 0], sizes = [1, 256], strides = [1, 1]} : vector<8x256xf32> to vector<1x256xf32>
    %142 = vector.extract_strided_slice %7 {offsets = [2, 0], sizes = [1, 256], strides = [1, 1]} : vector<8x256xf32> to vector<1x256xf32>
    %143 = arith.addf %141, %142 : vector<1x256xf32>
    %cst_29 = arith.constant dense<0.000000e+00> : vector<1x256xf32>
    %144 = tpu.matmul %140, %8, %cst_29 {dimension_numbers = #tpu.dot_dimension_numbers<[1], [0], [0], [1], [0, 0, 1, 1], [], []>} : vector<1x64xf32>, vector<64x256xf32>, vector<1x256xf32> -> vector<1x256xf32>
    %145 = arith.addf %143, %144 : vector<1x256xf32>
    %146 = vector.extract_strided_slice %145 {offsets = [0, 0], sizes = [1, 128], strides = [1, 1]} : vector<1x256xf32> to vector<1x128xf32>
    %147 = arith.negf %146 : vector<1x128xf32>
    %148 = math.exp %147 : vector<1x128xf32>
    %cst_30 = arith.constant 1.000000e+00 : f32
    %149 = vector.broadcast %cst_30 : f32 to vector<1x128xf32>
    %150 = arith.addf %149, %148 : vector<1x128xf32>
    %151 = arith.divf %149, %150 : vector<1x128xf32>
    %152 = vector.extract_strided_slice %145 {offsets = [0, 128], sizes = [1, 64], strides = [1, 1]} : vector<1x256xf32> to vector<1x64xf32>
    %153 = math.tanh %152 : vector<1x64xf32>
    %154 = vector.extract_strided_slice %145 {offsets = [0, 192], sizes = [1, 64], strides = [1, 1]} : vector<1x256xf32> to vector<1x64xf32>
    %155 = arith.negf %154 : vector<1x64xf32>
    %156 = math.exp %155 : vector<1x64xf32>
    %cst_31 = arith.constant 1.000000e+00 : f32
    %157 = vector.broadcast %cst_31 : f32 to vector<1x64xf32>
    %158 = arith.addf %157, %156 : vector<1x64xf32>
    %159 = arith.divf %157, %158 : vector<1x64xf32>
    %160 = vector.extract_strided_slice %151 {offsets = [0, 64], sizes = [1, 64], strides = [1, 1]} : vector<1x128xf32> to vector<1x64xf32>
    %161 = arith.mulf %160, %138 : vector<1x64xf32>
    %162 = vector.extract_strided_slice %151 {offsets = [0, 0], sizes = [1, 64], strides = [1, 1]} : vector<1x128xf32> to vector<1x64xf32>
    %163 = arith.mulf %162, %153 : vector<1x64xf32>
    %164 = arith.addf %161, %163 : vector<1x64xf32>
    %165 = math.tanh %164 : vector<1x64xf32>
    %166 = arith.mulf %159, %165 : vector<1x64xf32>
    %167 = vector.extract_strided_slice %5 {offsets = [6, 0], sizes = [1, 256], strides = [1, 1]} : vector<8x256xf32> to vector<1x256xf32>
    %168 = vector.extract_strided_slice %7 {offsets = [1, 0], sizes = [1, 256], strides = [1, 1]} : vector<8x256xf32> to vector<1x256xf32>
    %169 = arith.addf %167, %168 : vector<1x256xf32>
    %cst_32 = arith.constant dense<0.000000e+00> : vector<1x256xf32>
    %170 = tpu.matmul %166, %8, %cst_32 {dimension_numbers = #tpu.dot_dimension_numbers<[1], [0], [0], [1], [0, 0, 1, 1], [], []>} : vector<1x64xf32>, vector<64x256xf32>, vector<1x256xf32> -> vector<1x256xf32>
    %171 = arith.addf %169, %170 : vector<1x256xf32>
    %172 = vector.extract_strided_slice %171 {offsets = [0, 0], sizes = [1, 128], strides = [1, 1]} : vector<1x256xf32> to vector<1x128xf32>
    %173 = arith.negf %172 : vector<1x128xf32>
    %174 = math.exp %173 : vector<1x128xf32>
    %cst_33 = arith.constant 1.000000e+00 : f32
    %175 = vector.broadcast %cst_33 : f32 to vector<1x128xf32>
    %176 = arith.addf %175, %174 : vector<1x128xf32>
    %177 = arith.divf %175, %176 : vector<1x128xf32>
    %178 = vector.extract_strided_slice %171 {offsets = [0, 128], sizes = [1, 64], strides = [1, 1]} : vector<1x256xf32> to vector<1x64xf32>
    %179 = math.tanh %178 : vector<1x64xf32>
    %180 = vector.extract_strided_slice %171 {offsets = [0, 192], sizes = [1, 64], strides = [1, 1]} : vector<1x256xf32> to vector<1x64xf32>
    %181 = arith.negf %180 : vector<1x64xf32>
    %182 = math.exp %181 : vector<1x64xf32>
    %cst_34 = arith.constant 1.000000e+00 : f32
    %183 = vector.broadcast %cst_34 : f32 to vector<1x64xf32>
    %184 = arith.addf %183, %182 : vector<1x64xf32>
    %185 = arith.divf %183, %184 : vector<1x64xf32>
    %186 = vector.extract_strided_slice %177 {offsets = [0, 64], sizes = [1, 64], strides = [1, 1]} : vector<1x128xf32> to vector<1x64xf32>
    %187 = arith.mulf %186, %164 : vector<1x64xf32>
    %188 = vector.extract_strided_slice %177 {offsets = [0, 0], sizes = [1, 64], strides = [1, 1]} : vector<1x128xf32> to vector<1x64xf32>
    %189 = arith.mulf %188, %179 : vector<1x64xf32>
    %190 = arith.addf %187, %189 : vector<1x64xf32>
    %191 = math.tanh %190 : vector<1x64xf32>
    %192 = arith.mulf %185, %191 : vector<1x64xf32>
    %193 = vector.extract_strided_slice %5 {offsets = [7, 0], sizes = [1, 256], strides = [1, 1]} : vector<8x256xf32> to vector<1x256xf32>
    %194 = vector.extract_strided_slice %7 {offsets = [0, 0], sizes = [1, 256], strides = [1, 1]} : vector<8x256xf32> to vector<1x256xf32>
    %195 = arith.addf %193, %194 : vector<1x256xf32>
    %cst_35 = arith.constant dense<0.000000e+00> : vector<1x256xf32>
    %196 = tpu.matmul %192, %8, %cst_35 {dimension_numbers = #tpu.dot_dimension_numbers<[1], [0], [0], [1], [0, 0, 1, 1], [], []>} : vector<1x64xf32>, vector<64x256xf32>, vector<1x256xf32> -> vector<1x256xf32>
    %197 = arith.addf %195, %196 : vector<1x256xf32>
    %198 = vector.extract_strided_slice %197 {offsets = [0, 0], sizes = [1, 128], strides = [1, 1]} : vector<1x256xf32> to vector<1x128xf32>
    %199 = arith.negf %198 : vector<1x128xf32>
    %200 = math.exp %199 : vector<1x128xf32>
    %cst_36 = arith.constant 1.000000e+00 : f32
    %201 = vector.broadcast %cst_36 : f32 to vector<1x128xf32>
    %202 = arith.addf %201, %200 : vector<1x128xf32>
    %203 = arith.divf %201, %202 : vector<1x128xf32>
    %204 = vector.extract_strided_slice %197 {offsets = [0, 128], sizes = [1, 64], strides = [1, 1]} : vector<1x256xf32> to vector<1x64xf32>
    %205 = math.tanh %204 : vector<1x64xf32>
    %206 = vector.extract_strided_slice %197 {offsets = [0, 192], sizes = [1, 64], strides = [1, 1]} : vector<1x256xf32> to vector<1x64xf32>
    %207 = arith.negf %206 : vector<1x64xf32>
    %208 = math.exp %207 : vector<1x64xf32>
    %cst_37 = arith.constant 1.000000e+00 : f32
    %209 = vector.broadcast %cst_37 : f32 to vector<1x64xf32>
    %210 = arith.addf %209, %208 : vector<1x64xf32>
    %211 = arith.divf %209, %210 : vector<1x64xf32>
    %212 = vector.extract_strided_slice %203 {offsets = [0, 64], sizes = [1, 64], strides = [1, 1]} : vector<1x128xf32> to vector<1x64xf32>
    %213 = arith.mulf %212, %190 : vector<1x64xf32>
    %214 = vector.extract_strided_slice %203 {offsets = [0, 0], sizes = [1, 64], strides = [1, 1]} : vector<1x128xf32> to vector<1x64xf32>
    %215 = arith.mulf %214, %205 : vector<1x64xf32>
    %216 = arith.addf %213, %215 : vector<1x64xf32>
    %217 = math.tanh %216 : vector<1x64xf32>
    %218 = arith.mulf %211, %217 : vector<1x64xf32>
    %219 = vector.extract_strided_slice %36 {offsets = [0, 0], sizes = [1, 32], strides = [1, 1]} : vector<1x64xf32> to vector<1x32xf32>
    %220 = vector.extract_strided_slice %218 {offsets = [0, 32], sizes = [1, 32], strides = [1, 1]} : vector<1x64xf32> to vector<1x32xf32>
    %221 = tpu.concatenate %219, %220 in 1 : vector<1x32xf32>, vector<1x32xf32> -> vector<1x64xf32>
    %222 = vector.extract_strided_slice %62 {offsets = [0, 0], sizes = [1, 32], strides = [1, 1]} : vector<1x64xf32> to vector<1x32xf32>
    %223 = vector.extract_strided_slice %192 {offsets = [0, 32], sizes = [1, 32], strides = [1, 1]} : vector<1x64xf32> to vector<1x32xf32>
    %224 = tpu.concatenate %222, %223 in 1 : vector<1x32xf32>, vector<1x32xf32> -> vector<1x64xf32>
    %225 = vector.extract_strided_slice %88 {offsets = [0, 0], sizes = [1, 32], strides = [1, 1]} : vector<1x64xf32> to vector<1x32xf32>
    %226 = vector.extract_strided_slice %166 {offsets = [0, 32], sizes = [1, 32], strides = [1, 1]} : vector<1x64xf32> to vector<1x32xf32>
    %227 = tpu.concatenate %225, %226 in 1 : vector<1x32xf32>, vector<1x32xf32> -> vector<1x64xf32>
    %228 = vector.extract_strided_slice %114 {offsets = [0, 0], sizes = [1, 32], strides = [1, 1]} : vector<1x64xf32> to vector<1x32xf32>
    %229 = vector.extract_strided_slice %140 {offsets = [0, 32], sizes = [1, 32], strides = [1, 1]} : vector<1x64xf32> to vector<1x32xf32>
    %230 = tpu.concatenate %228, %229 in 1 : vector<1x32xf32>, vector<1x32xf32> -> vector<1x64xf32>
    %231 = vector.extract_strided_slice %140 {offsets = [0, 0], sizes = [1, 32], strides = [1, 1]} : vector<1x64xf32> to vector<1x32xf32>
    %232 = vector.extract_strided_slice %114 {offsets = [0, 32], sizes = [1, 32], strides = [1, 1]} : vector<1x64xf32> to vector<1x32xf32>
    %233 = tpu.concatenate %231, %232 in 1 : vector<1x32xf32>, vector<1x32xf32> -> vector<1x64xf32>
    %234 = vector.extract_strided_slice %166 {offsets = [0, 0], sizes = [1, 32], strides = [1, 1]} : vector<1x64xf32> to vector<1x32xf32>
    %235 = vector.extract_strided_slice %88 {offsets = [0, 32], sizes = [1, 32], strides = [1, 1]} : vector<1x64xf32> to vector<1x32xf32>
    %236 = tpu.concatenate %234, %235 in 1 : vector<1x32xf32>, vector<1x32xf32> -> vector<1x64xf32>
    %237 = vector.extract_strided_slice %192 {offsets = [0, 0], sizes = [1, 32], strides = [1, 1]} : vector<1x64xf32> to vector<1x32xf32>
    %238 = vector.extract_strided_slice %62 {offsets = [0, 32], sizes = [1, 32], strides = [1, 1]} : vector<1x64xf32> to vector<1x32xf32>
    %239 = tpu.concatenate %237, %238 in 1 : vector<1x32xf32>, vector<1x32xf32> -> vector<1x64xf32>
    %240 = vector.extract_strided_slice %218 {offsets = [0, 0], sizes = [1, 32], strides = [1, 1]} : vector<1x64xf32> to vector<1x32xf32>
    %241 = vector.extract_strided_slice %36 {offsets = [0, 32], sizes = [1, 32], strides = [1, 1]} : vector<1x64xf32> to vector<1x32xf32>
    %242 = tpu.concatenate %240, %241 in 1 : vector<1x32xf32>, vector<1x32xf32> -> vector<1x64xf32>
    %243 = tpu.concatenate %221, %224, %227, %230, %233, %236, %239, %242, %218 in 0 : vector<1x64xf32>, vector<1x64xf32>, vector<1x64xf32>, vector<1x64xf32>, vector<1x64xf32>, vector<1x64xf32>, vector<1x64xf32>, vector<1x64xf32>, vector<1x64xf32> -> vector<9x64xf32>
    %c0_38 = arith.constant 0 : index
    %c0_39 = arith.constant 0 : index
    %244 = vector.load %arg7[%c0_38, %c0_39] : memref<64x64xf32, #tpu.memory_space<vmem>>, vector<64x64xf32>
    %cst_40 = arith.constant dense<0.000000e+00> : vector<9x64xf32>
    %245 = tpu.matmul %243, %244, %cst_40 {dimension_numbers = #tpu.dot_dimension_numbers<[1], [0], [0], [1], [0, 0, 1, 1], [], []>} : vector<9x64xf32>, vector<64x64xf32>, vector<9x64xf32> -> vector<9x64xf32>
    %c0_41 = arith.constant 0 : index
    %c0_42 = arith.constant 0 : index
    %246 = vector.load %arg8[%c0_41, %c0_42] : memref<1x64xf32, #tpu.memory_space<vmem>>, vector<1x64xf32>
    %247 = vector.broadcast %246 : vector<1x64xf32> to vector<9x64xf32>
    %248 = arith.addf %245, %247 : vector<9x64xf32>
    %cst_43 = arith.constant 0.000000e+00 : f32
    %249 = vector.broadcast %cst_43 : f32 to vector<9x64xf32>
    %250 = arith.maximumf %248, %249 : vector<9x64xf32>
    %c0_44 = arith.constant 0 : index
    %c0_45 = arith.constant 0 : index
    %251 = vector.load %arg9[%c0_44, %c0_45] : memref<64x128xf32, #tpu.memory_space<vmem>>, vector<64x128xf32>
    %cst_46 = arith.constant dense<0.000000e+00> : vector<9x128xf32>
    %252 = tpu.matmul %250, %251, %cst_46 {dimension_numbers = #tpu.dot_dimension_numbers<[1], [0], [0], [1], [0, 0, 1, 1], [], []>} : vector<9x64xf32>, vector<64x128xf32>, vector<9x128xf32> -> vector<9x128xf32>
    %c0_47 = arith.constant 0 : index
    %c0_48 = arith.constant 0 : index
    %253 = vector.load %arg10[%c0_47, %c0_48] : memref<1x128xf32, #tpu.memory_space<vmem>>, vector<1x128xf32>
    %254 = vector.broadcast %253 : vector<1x128xf32> to vector<9x128xf32>
    %255 = arith.addf %252, %254 : vector<9x128xf32>
    %c0_49 = arith.constant 0 : index
    %c0_50 = arith.constant 0 : index
    %256 = vector.load %arg11[%c0_49, %c0_50] : memref<9x128xf32, #tpu.memory_space<vmem>>, vector<9x128xf32>
    tpu.vector_store %arg11[%c0_49, %c0_50], %255 {strides = array<i32>} : memref<9x128xf32, #tpu.memory_space<vmem>>, vector<9x128xf32>,
    return
  }
}

</mosaic_0001>

<bundles_post_ra>
// kernel: aggregator_forward.1
= control target key start
LH: loop header
LB: loop body
LE: loop exit
PB: predicated region body
PF: predicated region fallthrough
CT: control target
= control target key end

     0   :  { %16 = vsyncpa [#allocation3], 0  ;;  %s2270_s0 = inlined_call_operand.hbm [shape: f32[8,16], index: 0, kind: input, shape index: {}]   ;;  %s2271_s1 = inlined_call_operand.hbm [shape: f32[16,256], index: 1, kind: input, shape index: {}]   ;;  %s2272_s2 = inlined_call_operand.hbm [shape: f32[16,256], index: 2, kind: input, shape index: {}]   ;;  %s2273_s3 = inlined_call_operand.hbm [shape: f32[1,256], index: 3, kind: input, shape index: {}]   ;;  %s2274_s4 = inlined_call_operand.hbm [shape: f32[64,256], index: 4, kind: input, shape index: {}]   ;;  %s2275_s5 = inlined_call_operand.vmem [shape: f32[1,64], index: 5, kind: input, shape index: {}]   ;;  %s2276_s6 = inlined_call_operand.vmem [shape: f32[1,64], index: 6, kind: input, shape index: {}]   ;;  %s2277_s7 = inlined_call_operand.hbm [shape: f32[64,64], index: 7, kind: input, shape index: {}]   ;;  %s2278_s8 = inlined_call_operand.vmem [shape: f32[1,64], index: 8, kind: input, shape index: {}]   ;;  %s2279_s9 = inlined_call_operand.hbm [shape: f32[64,128], index: 9, kind: input, shape index: {}]   ;;  %s2280_s10 = inlined_call_operand.vmem [shape: f32[1,128], index: 10, kind: input, shape index: {}]   ;;  %s2281_s11 = inlined_call_operand.vmem [shape: f32[9,128], index: 11, kind: output, shape index: {}]  }
   0x1   :  { %17 = vsyncpa [#allocation5], 0 }
   0x2   :  { %18 = vsyncpa [#allocation8], 0 }
   0x3   :  { %19 = vsyncpa [#allocation11], 0  ;;  %s1845_s17 = smov [#allocation4]  }
   0x4   :  { %s35_s18 = sshll.u32 %s1845_s17, 4  ;;  %s36_s18 = int_to_ptr.vmem [resolvable:$true] %s35_s18 }
   0x5   :  { %s1705_s19 = scalar_lea.vmem %s36_s18, 512  ;;  %p1710_p1 = scmp.lt.s32.totalorder %s36_s18, %s36_s18 }
   0x6   :  { %p1706_p0 = scmp.ne.s32.totalorder %s36_s18, %s1705_s19  ;;  %p1711_p2 = scmp.lt.s32.totalorder %s1705_s19, %s1705_s19 }
   0x8   :  { %p1712_p3 = por %p1711_p2, %p1710_p1 }
   0xa   :  { %p1713_p4 = pnand %p1712_p3, %p1706_p0 }
   0xc   :  { %1716 = shalt.err (!%p1713_p4)
}
   0xd   :  { %s1846_s20 = smov 256   ;;  %s1847_s21 = smov 16  }
   0xe   :  { %41 = dma.hbm_to_vmem [thread:$0]  %s2271_s1, 512, %s36_s18, [#allocation5], %s1846_s20, %s1846_s20, %s1847_s21  }
   0xf   :  { %s1848_s24 = smov [#allocation7]   ;;  %s1849_s26 = smov [#allocation10]  }
  0x10   :  { %s60_s25 = sshll.u32 %s1848_s24, 4  ;;  %s85_s27 = sshll.u32 %s1849_s26, 4  ;;  %s61_s25 = int_to_ptr.vmem [resolvable:$true] %s60_s25  ;;  %s86_s27 = int_to_ptr.vmem [resolvable:$true] %s85_s27 }
  0x11   :  { %s1725_s28 = scalar_lea.vmem %s61_s25, 32  ;;  %p1730_p6 = scmp.lt.s32.totalorder %s61_s25, %s61_s25 }
  0x12   :  { %p1726_p5 = scmp.ne.s32.totalorder %s61_s25, %s1725_s28  ;;  %p1731_p7 = scmp.lt.s32.totalorder %s1725_s28, %s1725_s28 }
  0x14   :  { %p1732_p8 = por %p1731_p7, %p1730_p6 }
  0x16   :  { %p1733_p9 = pnand %p1732_p8, %p1726_p5 }
  0x18   :  { %1736 = shalt.err (!%p1733_p9)
}
  0x19   :  { %63 = dma.hbm_to_vmem [thread:$0]  %s2273_s3, 32, %s61_s25, [#allocation8]  }
  0x1a   :  { %s1745_s12 = scalar_lea.vmem %s86_s27, 1024  ;;  %p1750_p11 = scmp.lt.s32.totalorder %s86_s27, %s86_s27 }
  0x1b   :  { %p1746_p10 = scmp.ne.s32.totalorder %s86_s27, %s1745_s12  ;;  %p1751_p12 = scmp.lt.s32.totalorder %s1745_s12, %s1745_s12 }
  0x1d   :  { %p1752_p13 = por %p1751_p12, %p1750_p11 }
  0x1f   :  { %p1753_p0 = pnand %p1752_p13, %p1746_p10 }
  0x21   :  { %1756 = shalt.err (!%p1753_p0)
}
  0x22   :  { %s1850_s1 = smov 128   ;;  %s1851_s13 = smov 8  }
  0x23   :  { %91 = dma.hbm_to_vmem [thread:$0]  %s2277_s7, 1024, %s86_s27, [#allocation11], %s1850_s1, %s1850_s1, %s1851_s13  }
  0x24   :  { %s1852_s16 = smov [#allocation2]   ;;  %s1853_s3 = smov [#allocation6]  }
  0x25   :  { %s26_s17 = sshll.u32 %s1852_s16, 4  ;;  %s47_s18 = sshll.u32 %s1853_s3, 4  ;;  %s27_s17 = int_to_ptr.vmem [resolvable:$true] %s26_s17  ;;  %s48_s18 = int_to_ptr.vmem [resolvable:$true] %s47_s18 }
  0x26   :  { %s1765_s19 = scalar_lea.vmem %s27_s17, 128  ;;  %p1770_p2 = scmp.lt.s32.totalorder %s27_s17, %s27_s17 }
  0x27   :  { %p1766_p1 = scmp.ne.s32.totalorder %s27_s17, %s1765_s19  ;;  %p1771_p3 = scmp.lt.s32.totalorder %s1765_s19, %s1765_s19 }
  0x29   :  { %p1772_p4 = por %p1771_p3, %p1770_p2 }
  0x2b   :  { %p1773_p5 = pnand %p1772_p4, %p1766_p1 }
  0x2d   :  { %1776 = shalt.err (!%p1773_p5)
}
  0x2e   :  { %29 = dma.hbm_to_vmem [thread:$0]  %s2270_s0, 128, %s27_s17, [#allocation3]  }
  0x2f   :  { %s1785_s24 = scalar_lea.vmem %s48_s18, 512  ;;  %p1790_p7 = scmp.lt.s32.totalorder %s48_s18, %s48_s18 }
  0x30   :  { %p1786_p6 = scmp.ne.s32.totalorder %s48_s18, %s1785_s24  ;;  %p1791_p8 = scmp.lt.s32.totalorder %s1785_s24, %s1785_s24 }
  0x32   :  { %p1792_p9 = por %p1791_p8, %p1790_p7 }
  0x34   :  { %p1793_p10 = pnand %p1792_p9, %p1786_p6 }
  0x36   :  { %1796 = shalt.err (!%p1793_p10)
}
  0x37   :  { %53 = dma.hbm_to_vmem [thread:$0]  %s2272_s2, 512, %s48_s18, [#allocation5], %s1846_s20, %s1846_s20, %s1847_s21  }
  0x38   :  { %s1854_s26 = smov [#allocation9]   ;;  %s1855_s28 = smov [#allocation12]  }
  0x39   :  { %s69_s27 = sshll.u32 %s1854_s26, 4  ;;  %s99_s0 = sshll.u32 %s1855_s28, 4  ;;  %s70_s27 = int_to_ptr.vmem [resolvable:$true] %s69_s27  ;;  %s100_s0 = int_to_ptr.vmem [resolvable:$true] %s99_s0 }
  0x3a   :  { %s1805_s29 = scalar_lea.vmem %s70_s27, 2048  ;;  %p1810_p12 = scmp.lt.s32.totalorder %s70_s27, %s70_s27 }
  0x3b   :  { %p1806_p11 = scmp.ne.s32.totalorder %s70_s27, %s1805_s29  ;;  %p1811_p13 = scmp.lt.s32.totalorder %s1805_s29, %s1805_s29 }
  0x3d   :  { %p1812_p0 = por %p1811_p13, %p1810_p12 }
  0x3f   :  { %p1813_p1 = pnand %p1812_p0, %p1806_p11 }
  0x41   :  { %1816 = shalt.err (!%p1813_p1)
}
  0x42   :  { %75 = dma.hbm_to_vmem [thread:$0]  %s2274_s4, 2048, %s70_s27, [#allocation8], %s1846_s20, %s1846_s20, %s1847_s21  }
  0x43   :  { %s1825_s2 = scalar_lea.vmem %s100_s0, 1024  ;;  %p1830_p3 = scmp.lt.s32.totalorder %s100_s0, %s100_s0 }
  0x44   :  { %p1826_p2 = scmp.ne.s32.totalorder %s100_s0, %s1825_s2  ;;  %p1831_p4 = scmp.lt.s32.totalorder %s1825_s2, %s1825_s2 }
  0x46   :  { %p1832_p5 = por %p1831_p4, %p1830_p3 }
  0x48   :  { %p1833_p6 = pnand %p1832_p5, %p1826_p2 }
  0x4a   :  { %1836 = shalt.err (!%p1833_p6)
}
  0x4b   :  { %105 = dma.hbm_to_vmem [thread:$0]  %s2279_s9, 1024, %s100_s0, [#allocation11], %s1850_s1, %s1850_s1, %s1851_s13  }
  0x4c   :  { %1837 = dma.done.wait [#allocation3], 128  }
  0x4d   :  { %1838 = vsyncadd [#allocation3], 4294967168 }
  0x4e   :  { %1839 = dma.done.wait [#allocation5], 1024  }
  0x4f   :  { %1840 = vsyncadd [#allocation5], 4294966272 }
  0x50   :  { %1841 = dma.done.wait [#allocation8], 2080  }
  0x51   :  { %1842 = vsyncadd [#allocation8], 4294965216 }
  0x52   :  { %1843 = dma.done.wait [#allocation11], 2048  }
  0x53   :  { %1844 = vsyncadd [#allocation11], 4294965248  ;;  %v1856_v0 = vmov 0.0   ;;  %v133_v1 = vld [vmem:[#allocation4 + $0x18] sm:$0xff]  ;;  %v132_v3 = vld [vmem:[#allocation4 + $0x10] sm:$0xff]  ;;  %vm146_vm0 = vcmask 130048   ;;  %v136_v28 = vlaneseq }
  0x54   :  { %214 = vmatprep.mubr.f32.mxu0 %v1856_v0  ;;  %289 = vmatprep.mubr.f32.mxu1 %v1856_v0  ;;  %v224_v2 = vld [vmem:[#allocation6 + $0x18] sm:$0xff]  ;;  %v223_v4 = vld [vmem:[#allocation6 + $0x10] sm:$0xff]  ;;  %v131_v5 = vld [vmem:[#allocation4 + $0x8] sm:$0xff]  ;;  %s1857_s20 = smov 64   ;;  %vm322_vm1 = vcmask 523264   ;;  %vm1222_vm2 = vcmask 261120  }
  0x55   :  { %178 = vmatprep.subr.mxu0 %v133_v1  ;;  %253 = vmatprep.subr.mxu1 %v224_v2  ;;  %v222_v6 = vld [vmem:[#allocation6 + $0x8] sm:$0xff]  ;;  %v130_v7 = vld [vmem:[#allocation4] sm:$0xff]  ;;  %v129_v9 = vld [vmem:[#allocation2] sm:$0xff]  ;;  %v137_v29 = vshrl.u32 %v136_v28, 7  ;;  %vm1280_vm3 = vcmask 1040384   ;;  %vm1282_vm4 = vcmask 1041408  }
  0x56   :  { %179 = vmatpush1.msra.mxu0 %v132_v3  ;;  %254 = vmatpush1.msra.mxu1 %v223_v4  ;;  %v221_v8 = vld [vmem:[#allocation6] sm:$0xff]  ;;  %v1958_v11 = vld [vmem:[#allocation9 + $0x70] sm:$0xff]  ;;  %v1960_v12 = vld [vmem:[#allocation9 + $0x68] sm:$0xff]  ;;  %vm1284_vm5 = vcmask 1042432   ;;  %vm1286_vm6 = vcmask 1043456   ;;  %vm1288_vm7 = vcmask 1044480  }
  0x57   :  { %180 = vmatprep.subr.mxu0 %v131_v5  ;;  %255 = vmatprep.subr.mxu1 %v222_v6  ;;  %v1956_v10 = vld [vmem:[#allocation9 + $0x78] sm:$0xff]  ;;  %v1963_v13 = vld [vmem:[#allocation9 + $0x60] sm:$0xff]  ;;  %v1971_v15 = vld [vmem:[#allocation9 + $0x50] sm:$0xff]  ;;  %v138_v30 = vsub.s32 0, %v137_v29  ;;  %v142_v47 = vsub.s32 1, %v137_v29  ;;  %vm1290_vm8 = vcmask 1045504  }
  0x58   :  { %181 = vmatpush1.msra.mxu0 %v130_v7  ;;  %256 = vmatpush1.msra.mxu1 %v221_v8  ;;  %v1967_v14 = vld [vmem:[#allocation9 + $0x58] sm:$0xff]  ;;  %v1502_v16 = vld [vmem:[%s2276_s6] ss:$0 sm:$0xff]  ;;  %v1978_v17 = vld [vmem:[#allocation9 + $0x48] sm:$0xff]  ;;  %vm1292_vm9 = vcmask 1046528  }
  0x59   :  { %1497 = vmatmul.mubr.msk.f32.vlgmr.msra.gmra.mxu0 %vm146_vm0, %v129_v9  ;;  %1498 = vmatmul.mubr.msk.f32.vlgmr.msra.gmra.mxu1 %vm146_vm0, %v129_v9  ;;  %v1982_v18 = vld [vmem:[#allocation9 + $0x40] sm:$0xff]  ;;  %v1986_v19 = vld [vmem:[#allocation9 + $0x38] sm:$0xff]  ;;  %v1990_v20 = vld [vmem:[#allocation9 + $0x30] sm:$0xff] }
  0x5a   :  { %342 = vmatprep.subr.mxu0 %v1956_v10  ;;  %390 = vmatprep.mubr.f32.mxu0 %v1856_v0  ;;  %v1994_v21 = vld [vmem:[#allocation9 + $0x28] sm:$0xff]  ;;  %v1998_v22 = vld [vmem:[#allocation9 + $0x20] sm:$0xff]  ;;  %v2002_v23 = vld [vmem:[#allocation9 + $0x18] sm:$0xff] }
  0x5b   :  { %343 = vmatpush1.msra.mxu0 %v1958_v11  ;;  %456 = vmatprep.subr.mxu1 %v1956_v10  ;;  %v2006_v24 = vld [vmem:[#allocation9 + $0x10] sm:$0xff]  ;;  %v2010_v25 = vld [vmem:[#allocation9 + $0x8] sm:$0xff]  ;;  %v2014_v26 = vld [vmem:[#allocation9] sm:$0xff] }
  0x5c   :  { %344 = vmatprep.subr.mxu0 %v1960_v12  ;;  %457 = vmatpush1.msra.mxu1 %v1958_v11  ;;  %v312_v27 = vld [vmem:[%s2275_s5] sm:$0x1]  ;;  %v134_v31 = vld [vmem:[#allocation7] sm:$0x3] }
  0x5d   :  { %345 = vmatpush1.msra.mxu0 %v1963_v13  ;;  %417 = vrot.lane.b32.xlu0 %v1502_v16, %s1857_s20  ;;  %v139_v32 = vrot.slane %v134_v31, %v138_v30  ;;  %v143_v49 = vrot.slane %v134_v31, %v142_v47 }
  0x5e   :  { %346 = vmatprep.subr.mxu0 %v1967_v14  ;;  %458 = vmatprep.subr.mxu1 %v1960_v12 }
  0x5f   :  { %347 = vmatpush1.msra.mxu0 %v1971_v15  ;;  %459 = vmatpush1.msra.mxu1 %v1963_v13 }
  0x60   :  { %348 = vmatprep.subr.mxu0 %v1978_v17  ;;  %460 = vmatprep.subr.mxu1 %v1967_v14 }
  0x61   :  { %349 = vmatpush1.msra.mxu0 %v1982_v18  ;;  %461 = vmatpush1.msra.mxu1 %v1971_v15 }
  0x62   :  { %350 = vmatprep.subr.mxu0 %v1986_v19  ;;  %462 = vmatprep.subr.mxu1 %v1978_v17 }
  0x63   :  { %351 = vmatpush1.msra.mxu0 %v1990_v20  ;;  %463 = vmatpush1.msra.mxu1 %v1982_v18 }
  0x64   :  { %352 = vmatprep.subr.mxu0 %v1994_v21  ;;  %464 = vmatprep.subr.mxu1 %v1986_v19 }
  0x65   :  { %353 = vmatpush1.msra.mxu0 %v1998_v22  ;;  %465 = vmatpush1.msra.mxu1 %v1990_v20 }
  0x66   :  { %354 = vmatprep.subr.mxu0 %v2002_v23  ;;  %466 = vmatprep.subr.mxu1 %v1994_v21 }
  0x67   :  { %355 = vmatpush1.msra.mxu0 %v2006_v24  ;;  %467 = vmatpush1.msra.mxu1 %v1998_v22 }
  0x68   :  { %356 = vmatprep.subr.mxu0 %v2010_v25  ;;  %468 = vmatprep.subr.mxu1 %v2002_v23 }
  0x69   :  { %357 = vmatpush1.msra.mxu0 %v2014_v26  ;;  %469 = vmatpush1.msra.mxu1 %v2006_v24 }
  0x6a   :  { %1499 = vmatmul.mubr.msk.f32.vlgmr.msra.gmra.mxu0 %vm322_vm1, %v312_v27  ;;  %470 = vmatprep.subr.mxu1 %v2010_v25 }
  0x6b   :  { %471 = vmatpush1.msra.mxu1 %v2014_v26  ;;  %504 = vmatprep.mubr.f32.mxu1 %v1856_v0 }
  0x6c   :  { %572 = vmatprep.subr.mxu0 %v1956_v10  ;;  %620 = vmatprep.mubr.f32.mxu0 %v1856_v0 }
  0x6d   :  { %573 = vmatpush1.msra.mxu0 %v1958_v11  ;;  %688 = vmatprep.subr.mxu1 %v1956_v10 }
  0x6e   :  { %574 = vmatprep.subr.mxu0 %v1960_v12 }
  0x6f   :  { %575 = vmatpush1.msra.mxu0 %v1963_v13 }
  0x70   :  { %576 = vmatprep.subr.mxu0 %v1967_v14 }
  0x71   :  { %577 = vmatpush1.msra.mxu0 %v1971_v15 }
  0x72   :  { %578 = vmatprep.subr.mxu0 %v1978_v17 }
  0x73   :  { %579 = vmatpush1.msra.mxu0 %v1982_v18 }
  0x74   :  { %580 = vmatprep.subr.mxu0 %v1986_v19 }
  0x75   :  { %581 = vmatpush1.msra.mxu0 %v1990_v20 }
  0x76   :  { %582 = vmatprep.subr.mxu0 %v1994_v21 }
  0x77   :  { %583 = vmatpush1.msra.mxu0 %v1998_v22 }
  0x78   :  { %584 = vmatprep.subr.mxu0 %v2002_v23 }
  0x79   :  { %585 = vmatpush1.msra.mxu0 %v2006_v24 }
  0x7a   :  { %586 = vmatprep.subr.mxu0 %v2010_v25 }
  0x7b   :  { %587 = vmatpush1.msra.mxu0 %v2014_v26 }
  0x7c   :  { %798 = vmatprep.subr.mxu0 %v1956_v10 }
  0xcf   :  { %v418_v63 = vpop.permute.xlu0 %417 }
 0x119   :  { %v216_v33 = vpop.f32.mrf.mxu0  ;;  %v291_v34 = vpop.f32.mrf.mxu1 }
 0x11a   :  { %v217_v35 = vadd.f32 %v216_v33, %v139_v32  ;;  %v429_v36 = vrot.slane %v291_v34, 5  ;;  %v544_v37 = vrot.slane %v291_v34, 3  ;;  %v660_v38 = vrot.slane %v291_v34, 1 }
 0x11b   :  { %v316_v42 = vrot.slane %v291_v34, 7  ;;  %v218_v43 = vpop.f32.mrf.mxu0  ;;  %v2058_v50 = vpop.f32.mrf.mxu1 }
 0x11c   :  { %v2049_v39 = vadd.f32 %v429_v36, %v217_v35  ;;  %v2051_v40 = vadd.f32 %v544_v37, %v217_v35  ;;  %v2053_v41 = vadd.f32 %v660_v38, %v217_v35  ;;  %v2060_v51 = vadd.f32 %v218_v43, %v143_v49 }
 0x11d   :  { %v2055_v44 = vadd.f32 %v316_v42, %v217_v35  ;;  %v317_v52 = vrot.slane %v2058_v50, 7  ;;  %v430_v30 = vrot.slane %v2058_v50, 5 }
 0x11f   :  { %v2064_v54 = vadd.f32 %v317_v52, %v2060_v51  ;;  %v2096_v32 = vadd.f32 %v430_v30, %v2060_v51 }
 0x12a   :  { %v392_v45 = vpop.f32.mrf.mxu0 }
 0x12b   :  { %v397_v46 = vadd.f32 %v392_v45, %v2055_v44 }
 0x12c   :  { %v394_v53 = vpop.f32.mrf.mxu0 }
 0x12d   :  { %v1500_v48 = vmul.f32 -1.442695, %v397_v46  ;;  %v398_v55 = vadd.f32 %v394_v53, %v2064_v54 }
 0x12f   :  { %1601 = vpow2.f32 %v1500_v48  ;;  %v1501_v61 = vmul.f32 -1.442695, %v398_v55 }
 0x130   :  { %1603 = vtanh.f32 %v398_v55 }
 0x13c   :  { %v1602_v56 = vpop.eup %1601 }
 0x13d   :  { %v402_v57 = vadd.f32 1.0, %v1602_v56  ;;  %v1604_v58 = vpop.eup %1603 }
 0x13f   :  { %1605 = vrcp.f32 %v402_v57 }
 0x140   :  { %1607 = vpow2.f32 %v1501_v61 }
 0x14c   :  { %v1606_v59 = vpop.eup %1605 }
 0x14d   :  { %v421_v60 = vmul.f32 %v1606_v59, %v1604_v58  ;;  %v1608_v62 = vpop.eup %1607  ;;  %v420_v2 = vmul.f32 %v1606_v59, %v418_v63  ;;  %v545_v63 = vrot.slane %v2058_v50, 3 }
 0x14e   :  { %v409_v1 = vadd.f32 1.0, %v1608_v62 }
 0x14f   :  { %423 = vrot.lane.b32.xlu0 %v421_v60, %s1857_s20 }
 0x150   :  { %1609 = vrcp.f32 %v409_v1 }
 0x15d   :  { %v1610_v5 = vpop.eup %1609 }
 0x1c1   :  { %v424_v3 = vpop.permute.xlu0 %423 }
 0x1c2   :  { %v426_v4 = vadd.f32 %v424_v3, %v420_v2  ;;  %v2125_v2 = vadd.f32 %v545_v63, %v2060_v51 }
 0x1c4   :  { %1611 = vtanh.f32 %v426_v4  ;;  %v533_v37 = vrot.slane %v426_v4, 7 }
 0x1d1   :  { %v1612_v6 = vpop.eup %1611 }
 0x1d2   :  { %v2068_v7 = vmul.f32 %v1612_v6, %v1610_v5 }
 0x1d4   :  { %436 = vrot.lane.b32.xlu1 %v2068_v7, %s1857_s20 }
 0x246   :  { %v2072_v8 = vpop.permute.xlu1 %436 }
 0x247   :  { %1503 = vmatmul.mubr.msk.f32.vlgmr.msra.gmra.mxu1 %vm322_vm1, %v2072_v8 }
 0x248   :  { %689 = vmatpush1.msra.mxu1 %v1958_v11  ;;  %736 = vmatprep.mubr.f32.mxu1 %v1856_v0 }
 0x249   :  { %690 = vmatprep.subr.mxu1 %v1960_v12 }
 0x24a   :  { %691 = vmatpush1.msra.mxu1 %v1963_v13 }
 0x24b   :  { %692 = vmatprep.subr.mxu1 %v1967_v14 }
 0x24c   :  { %693 = vmatpush1.msra.mxu1 %v1971_v15 }
 0x24d   :  { %694 = vmatprep.subr.mxu1 %v1978_v17 }
 0x24e   :  { %695 = vmatpush1.msra.mxu1 %v1982_v18 }
 0x24f   :  { %696 = vmatprep.subr.mxu1 %v1986_v19 }
 0x250   :  { %697 = vmatpush1.msra.mxu1 %v1990_v20 }
 0x251   :  { %698 = vmatprep.subr.mxu1 %v1994_v21 }
 0x252   :  { %699 = vmatpush1.msra.mxu1 %v1998_v22 }
 0x253   :  { %700 = vmatprep.subr.mxu1 %v2002_v23 }
 0x254   :  { %701 = vmatpush1.msra.mxu1 %v2006_v24 }
 0x255   :  { %702 = vmatprep.subr.mxu1 %v2010_v25 }
 0x256   :  { %703 = vmatpush1.msra.mxu1 %v2014_v26 }
 0x257   :  { %908 = vmatprep.subr.mxu1 %v1956_v10 }
 0x307   :  { %v506_v9 = vpop.f32.mrf.mxu1 }
 0x308   :  { %v513_v16 = vrot.slane %v506_v9, 7 }
 0x309   :  { %v508_v29 = vpop.f32.mrf.mxu1 }
 0x30a   :  { %v517_v27 = vadd.f32 %v513_v16, %v2049_v39  ;;  %v514_v31 = vrot.slane %v508_v29, 7 }
 0x30c   :  { %v1504_v28 = vmul.f32 -1.442695, %v517_v27  ;;  %v518_v33 = vadd.f32 %v514_v31, %v2096_v32 }
 0x30e   :  { %1613 = vpow2.f32 %v1504_v28  ;;  %v1505_v45 = vmul.f32 -1.442695, %v518_v33 }
 0x30f   :  { %1615 = vtanh.f32 %v518_v33 }
 0x31b   :  { %v1614_v34 = vpop.eup %1613 }
 0x31c   :  { %v522_v35 = vadd.f32 1.0, %v1614_v34  ;;  %v1616_v36 = vpop.eup %1615 }
 0x31e   :  { %1617 = vrcp.f32 %v522_v35 }
 0x31f   :  { %1619 = vpow2.f32 %v1505_v45 }
 0x32b   :  { %v1618_v38 = vpop.eup %1617 }
 0x32c   :  { %v536_v42 = vmul.f32 %v1618_v38, %v1616_v36  ;;  %v535_v43 = vmul.f32 %v1618_v38, %v533_v37  ;;  %v1620_v46 = vpop.eup %1619 }
 0x32d   :  { %v529_v47 = vadd.f32 1.0, %v1620_v46 }
 0x32e   :  { %538 = vrot.lane.b32.xlu1 %v536_v42, %s1857_s20 }
 0x32f   :  { %1621 = vrcp.f32 %v529_v47 }
 0x33c   :  { %v1622_v52 = vpop.eup %1621 }
 0x3a0   :  { %v539_v48 = vpop.permute.xlu1 %538 }
 0x3a1   :  { %v541_v49 = vadd.f32 %v539_v48, %v535_v43 }
 0x3a3   :  { %1623 = vtanh.f32 %v541_v49  ;;  %v649_v9 = vrot.slane %v541_v49, 7  ;;  %v661_v49 = vrot.slane %v2058_v50, 1 }
 0x3b0   :  { %v1624_v53 = vpop.eup %1623 }
 0x3b1   :  { %v2100_v55 = vmul.f32 %v1624_v53, %v1622_v52  ;;  %v2154_v53 = vadd.f32 %v661_v49, %v2060_v51 }
 0x3b3   :  { %v551_v56 = vrot.slane %v2100_v55, 1 }
 0x3b5   :  { %552 = vrot.lane.b32.xlu0 %v551_v56, %s1857_s20 }
 0x427   :  { %v553_v57 = vpop.permute.xlu0 %552 }
 0x428   :  { %1506 = vmatmul.mubr.msk.f32.vlgmr.msra.gmra.mxu0 %vm322_vm1, %v553_v57 }
 0x429   :  { %799 = vmatpush1.msra.mxu0 %v1958_v11  ;;  %846 = vmatprep.mubr.f32.mxu0 %v1856_v0 }
 0x42a   :  { %800 = vmatprep.subr.mxu0 %v1960_v12 }
 0x42b   :  { %801 = vmatpush1.msra.mxu0 %v1963_v13 }
 0x42c   :  { %802 = vmatprep.subr.mxu0 %v1967_v14 }
 0x42d   :  { %803 = vmatpush1.msra.mxu0 %v1971_v15 }
 0x42e   :  { %804 = vmatprep.subr.mxu0 %v1978_v17 }
 0x42f   :  { %805 = vmatpush1.msra.mxu0 %v1982_v18 }
 0x430   :  { %806 = vmatprep.subr.mxu0 %v1986_v19 }
 0x431   :  { %807 = vmatpush1.msra.mxu0 %v1990_v20 }
 0x432   :  { %808 = vmatprep.subr.mxu0 %v1994_v21 }
 0x433   :  { %809 = vmatpush1.msra.mxu0 %v1998_v22 }
 0x434   :  { %810 = vmatprep.subr.mxu0 %v2002_v23 }
 0x435   :  { %811 = vmatpush1.msra.mxu0 %v2006_v24 }
 0x436   :  { %812 = vmatprep.subr.mxu0 %v2010_v25 }
 0x437   :  { %813 = vmatpush1.msra.mxu0 %v2014_v26 }
 0x438   :  { %1018 = vmatprep.subr.mxu0 %v1956_v10 }
 0x4e8   :  { %v622_v58 = vpop.f32.mrf.mxu0 }
 0x4e9   :  { %v629_v59 = vrot.slane %v622_v58, 6 }
 0x4ea   :  { %v624_v62 = vpop.f32.mrf.mxu0 }
 0x4eb   :  { %v633_v60 = vadd.f32 %v629_v59, %v2051_v40  ;;  %v630_v1 = vrot.slane %v624_v62, 6 }
 0x4ed   :  { %v1507_v61 = vmul.f32 -1.442695, %v633_v60  ;;  %v634_v3 = vadd.f32 %v630_v1, %v2125_v2 }
 0x4ef   :  { %1625 = vpow2.f32 %v1507_v61  ;;  %v1508_v29 = vmul.f32 -1.442695, %v634_v3 }
 0x4f0   :  { %1627 = vtanh.f32 %v634_v3 }
 0x4fc   :  { %v1626_v4 = vpop.eup %1625 }
 0x4fd   :  { %v638_v5 = vadd.f32 1.0, %v1626_v4  ;;  %v1628_v6 = vpop.eup %1627 }
 0x4ff   :  { %1629 = vrcp.f32 %v638_v5 }
 0x500   :  { %1631 = vpow2.f32 %v1508_v29 }
 0x50c   :  { %v1630_v16 = vpop.eup %1629 }
 0x50d   :  { %v652_v27 = vmul.f32 %v1630_v16, %v1628_v6  ;;  %v651_v28 = vmul.f32 %v1630_v16, %v649_v9  ;;  %v1632_v30 = vpop.eup %1631 }
 0x50e   :  { %v645_v31 = vadd.f32 1.0, %v1632_v30 }
 0x50f   :  { %654 = vrot.lane.b32.xlu1 %v652_v27, %s1857_s20 }
 0x510   :  { %1633 = vrcp.f32 %v645_v31 }
 0x51d   :  { %v1634_v35 = vpop.eup %1633 }
 0x581   :  { %v655_v33 = vpop.permute.xlu1 %654 }
 0x582   :  { %v657_v34 = vadd.f32 %v655_v33, %v651_v28 }
 0x584   :  { %1635 = vtanh.f32 %v657_v34  ;;  %v765_v59 = vrot.slane %v657_v34, 7 }
 0x591   :  { %v1636_v36 = vpop.eup %1635 }
 0x592   :  { %v2129_v37 = vmul.f32 %v1636_v36, %v1634_v35 }
 0x594   :  { %v667_v38 = vrot.slane %v2129_v37, 2 }
 0x596   :  { %668 = vrot.lane.b32.xlu0 %v667_v38, %s1857_s20 }
 0x608   :  { %v669_v42 = vpop.permute.xlu0 %668 }
 0x609   :  { %1509 = vmatmul.mubr.msk.f32.vlgmr.msra.gmra.mxu1 %vm322_vm1, %v669_v42 }
 0x60a   :  { %909 = vmatpush1.msra.mxu1 %v1958_v11  ;;  %956 = vmatprep.mubr.f32.mxu1 %v1856_v0 }
 0x60b   :  { %910 = vmatprep.subr.mxu1 %v1960_v12 }
 0x60c   :  { %911 = vmatpush1.msra.mxu1 %v1963_v13 }
 0x60d   :  { %912 = vmatprep.subr.mxu1 %v1967_v14 }
 0x60e   :  { %913 = vmatpush1.msra.mxu1 %v1971_v15 }
 0x60f   :  { %914 = vmatprep.subr.mxu1 %v1978_v17 }
 0x610   :  { %915 = vmatpush1.msra.mxu1 %v1982_v18 }
 0x611   :  { %916 = vmatprep.subr.mxu1 %v1986_v19 }
 0x612   :  { %917 = vmatpush1.msra.mxu1 %v1990_v20 }
 0x613   :  { %918 = vmatprep.subr.mxu1 %v1994_v21 }
 0x614   :  { %919 = vmatpush1.msra.mxu1 %v1998_v22 }
 0x615   :  { %920 = vmatprep.subr.mxu1 %v2002_v23 }
 0x616   :  { %921 = vmatpush1.msra.mxu1 %v2006_v24 }
 0x617   :  { %922 = vmatprep.subr.mxu1 %v2010_v25 }
 0x618   :  { %923 = vmatpush1.msra.mxu1 %v2014_v26 }
 0x619   :  { %1128 = vmatprep.subr.mxu1 %v1956_v10 }
 0x6c9   :  { %v738_v43 = vpop.f32.mrf.mxu1 }
 0x6ca   :  { %v745_v45 = vrot.slane %v738_v43, 5 }
 0x6cb   :  { %v740_v48 = vpop.f32.mrf.mxu1 }
 0x6cc   :  { %v749_v46 = vadd.f32 %v745_v45, %v2053_v41  ;;  %v746_v52 = vrot.slane %v740_v48, 5 }
 0x6ce   :  { %v1510_v47 = vmul.f32 -1.442695, %v749_v46  ;;  %v750_v56 = vadd.f32 %v746_v52, %v2154_v53 }
 0x6d0   :  { %1637 = vpow2.f32 %v1510_v47  ;;  %v1511_v63 = vmul.f32 -1.442695, %v750_v56 }
 0x6d1   :  { %1639 = vtanh.f32 %v750_v56 }
 0x6dd   :  { %v1638_v57 = vpop.eup %1637 }
 0x6de   :  { %v754_v58 = vadd.f32 1.0, %v1638_v57  ;;  %v1640_v10 = vpop.eup %1639 }
 0x6e0   :  { %1641 = vrcp.f32 %v754_v58 }
 0x6e1   :  { %1643 = vpow2.f32 %v1511_v63 }
 0x6ed   :  { %v1642_v60 = vpop.eup %1641 }
 0x6ee   :  { %v768_v61 = vmul.f32 %v1642_v60, %v1640_v10  ;;  %v767_v62 = vmul.f32 %v1642_v60, %v765_v59  ;;  %v1644_v50 = vpop.eup %1643 }
 0x6ef   :  { %v761_v1 = vadd.f32 1.0, %v1644_v50 }
 0x6f0   :  { %770 = vrot.lane.b32.xlu1 %v768_v61, %s1857_s20 }
 0x6f1   :  { %1645 = vrcp.f32 %v761_v1 }
 0x6fe   :  { %v1646_v4 = vpop.eup %1645 }
 0x762   :  { %v771_v3 = vpop.permute.xlu1 %770 }
 0x763   :  { %v773_v51 = vadd.f32 %v771_v3, %v767_v62 }
 0x765   :  { %1647 = vtanh.f32 %v773_v51  ;;  %v875_v42 = vrot.slane %v773_v51, 7 }
 0x772   :  { %v1648_v5 = vpop.eup %1647 }
 0x773   :  { %v2158_v6 = vmul.f32 %v1648_v5, %v1646_v4 }
 0x775   :  { %v777_v9 = vrot.slane %v2158_v6, 3 }
 0x777   :  { %778 = vrot.lane.b32.xlu0 %v777_v9, %s1857_s20 }
 0x7e9   :  { %v779_v16 = vpop.permute.xlu0 %778 }
 0x7ea   :  { %1512 = vmatmul.mubr.msk.f32.vlgmr.msra.gmra.mxu0 %vm322_vm1, %v779_v16 }
 0x7eb   :  { %1019 = vmatpush1.msra.mxu0 %v1958_v11  ;;  %1066 = vmatprep.mubr.f32.mxu0 %v1856_v0 }
 0x7ec   :  { %1020 = vmatprep.subr.mxu0 %v1960_v12 }
 0x7ed   :  { %1021 = vmatpush1.msra.mxu0 %v1963_v13 }
 0x7ee   :  { %1022 = vmatprep.subr.mxu0 %v1967_v14 }
 0x7ef   :  { %1023 = vmatpush1.msra.mxu0 %v1971_v15 }
 0x7f0   :  { %1024 = vmatprep.subr.mxu0 %v1978_v17 }
 0x7f1   :  { %1025 = vmatpush1.msra.mxu0 %v1982_v18 }
 0x7f2   :  { %1026 = vmatprep.subr.mxu0 %v1986_v19 }
 0x7f3   :  { %1027 = vmatpush1.msra.mxu0 %v1990_v20 }
 0x7f4   :  { %1028 = vmatprep.subr.mxu0 %v1994_v21 }
 0x7f5   :  { %1029 = vmatpush1.msra.mxu0 %v1998_v22 }
 0x7f6   :  { %1030 = vmatprep.subr.mxu0 %v2002_v23 }
 0x7f7   :  { %1031 = vmatpush1.msra.mxu0 %v2006_v24 }
 0x7f8   :  { %1032 = vmatprep.subr.mxu0 %v2010_v25 }
 0x7f9   :  { %1033 = vmatpush1.msra.mxu0 %v2014_v26 }
 0x8aa   :  { %v848_v27 = vpop.f32.mrf.mxu0 }
 0x8ab   :  { %v855_v28 = vrot.slane %v848_v27, 4 }
 0x8ac   :  { %v850_v31 = vpop.f32.mrf.mxu0 }
 0x8ad   :  { %v859_v29 = vadd.f32 %v855_v28, %v2055_v44  ;;  %v856_v33 = vrot.slane %v850_v31, 4 }
 0x8af   :  { %v1513_v30 = vmul.f32 -1.442695, %v859_v29  ;;  %v860_v34 = vadd.f32 %v856_v33, %v2064_v54 }
 0x8b1   :  { %1649 = vpow2.f32 %v1513_v30  ;;  %v1514_v47 = vmul.f32 -1.442695, %v860_v34 }
 0x8b2   :  { %1651 = vtanh.f32 %v860_v34 }
 0x8be   :  { %v1650_v35 = vpop.eup %1649 }
 0x8bf   :  { %v864_v36 = vadd.f32 1.0, %v1650_v35  ;;  %v1652_v38 = vpop.eup %1651 }
 0x8c1   :  { %1653 = vrcp.f32 %v864_v36 }
 0x8c2   :  { %1655 = vpow2.f32 %v1514_v47 }
 0x8ce   :  { %v1654_v43 = vpop.eup %1653 }
 0x8cf   :  { %v878_v45 = vmul.f32 %v1654_v43, %v1652_v38  ;;  %v877_v46 = vmul.f32 %v1654_v43, %v875_v42  ;;  %v1656_v44 = vpop.eup %1655 }
 0x8d0   :  { %v871_v48 = vadd.f32 1.0, %v1656_v44 }
 0x8d1   :  { %880 = vrot.lane.b32.xlu1 %v878_v45, %s1857_s20 }
 0x8d2   :  { %1657 = vrcp.f32 %v871_v48 }
 0x8df   :  { %v1658_v54 = vpop.eup %1657 }
 0x943   :  { %v881_v49 = vpop.permute.xlu1 %880 }
 0x944   :  { %v883_v52 = vadd.f32 %v881_v49, %v877_v46  ;;  %v1251_v49 = vrot.slane %v2158_v6, 7 }
 0x946   :  { %1659 = vtanh.f32 %v883_v52 }
 0x953   :  { %v1660_v56 = vpop.eup %1659 }
 0x954   :  { %v2182_v57 = vmul.f32 %v1660_v56, %v1658_v54 }
 0x956   :  { %v887_v58 = vrot.slane %v2182_v57, 4  ;;  %v1243_v48 = vrot.slane %v2182_v57, 1 }
 0x958   :  { %888 = vrot.lane.b32.xlu0 %v887_v58, %s1857_s20 }
 0x9ca   :  { %v889_v10 = vpop.permute.xlu0 %888 }
 0x9cb   :  { %1515 = vmatmul.mubr.msk.f32.vlgmr.msra.gmra.mxu1 %vm322_vm1, %v889_v10 }
 0x9cc   :  { %1129 = vmatpush1.msra.mxu1 %v1958_v11  ;;  %1176 = vmatprep.mubr.f32.mxu1 %v1856_v0 }
 0x9cd   :  { %1130 = vmatprep.subr.mxu1 %v1960_v12 }
 0x9ce   :  { %1131 = vmatpush1.msra.mxu1 %v1963_v13 }
 0x9cf   :  { %1132 = vmatprep.subr.mxu1 %v1967_v14 }
 0x9d0   :  { %1133 = vmatpush1.msra.mxu1 %v1971_v15 }
 0x9d1   :  { %1134 = vmatprep.subr.mxu1 %v1978_v17 }
 0x9d2   :  { %1135 = vmatpush1.msra.mxu1 %v1982_v18 }
 0x9d3   :  { %1136 = vmatprep.subr.mxu1 %v1986_v19 }
 0x9d4   :  { %1137 = vmatpush1.msra.mxu1 %v1990_v20 }
 0x9d5   :  { %1138 = vmatprep.subr.mxu1 %v1994_v21  ;;  %v985_v21 = vrot.slane %v883_v52, 7  ;;  %v1259_v52 = vrot.slane %v2129_v37, 5 }
 0x9d6   :  { %1139 = vmatpush1.msra.mxu1 %v1998_v22 }
 0x9d7   :  { %1140 = vmatprep.subr.mxu1 %v2002_v23 }
 0x9d8   :  { %1141 = vmatpush1.msra.mxu1 %v2006_v24 }
 0x9d9   :  { %1142 = vmatprep.subr.mxu1 %v2010_v25 }
 0x9da   :  { %1143 = vmatpush1.msra.mxu1 %v2014_v26 }
 0xa8b   :  { %v958_v0 = vpop.f32.mrf.mxu1 }
 0xa8c   :  { %v965_v11 = vrot.slane %v958_v0, 3 }
 0xa8d   :  { %v960_v14 = vpop.f32.mrf.mxu1 }
 0xa8e   :  { %v969_v12 = vadd.f32 %v965_v11, %v2049_v39  ;;  %v966_v15 = vrot.slane %v960_v14, 3 }
 0xa90   :  { %v1516_v13 = vmul.f32 -1.442695, %v969_v12  ;;  %v970_v17 = vadd.f32 %v966_v15, %v2096_v32 }
 0xa92   :  { %1661 = vpow2.f32 %v1516_v13  ;;  %v1517_v25 = vmul.f32 -1.442695, %v970_v17 }
 0xa93   :  { %1663 = vtanh.f32 %v970_v17 }
 0xa9f   :  { %v1662_v18 = vpop.eup %1661 }
 0xaa0   :  { %v974_v19 = vadd.f32 1.0, %v1662_v18  ;;  %v1664_v20 = vpop.eup %1663 }
 0xaa2   :  { %1665 = vrcp.f32 %v974_v19 }
 0xaa3   :  { %1667 = vpow2.f32 %v1517_v25  ;;  %v1299_v25 = vld [vmem:[#allocation10 + $0x28] sm:$0xff] }
 0xaaf   :  { %v1666_v22 = vpop.eup %1665 }
 0xab0   :  { %v988_v23 = vmul.f32 %v1666_v22, %v1664_v20  ;;  %v987_v24 = vmul.f32 %v1666_v22, %v985_v21  ;;  %v1668_v26 = vpop.eup %1667 }
 0xab1   :  { %v981_v39 = vadd.f32 1.0, %v1668_v26  ;;  %v1297_v26 = vld [vmem:[#allocation10 + $0x18] sm:$0xff] }
 0xab2   :  { %990 = vrot.lane.b32.xlu1 %v988_v23, %s1857_s20 }
 0xab3   :  { %1669 = vrcp.f32 %v981_v39  ;;  %v1296_v39 = vld [vmem:[#allocation10 + $0x10] sm:$0xff] }
 0xac0   :  { %v1670_v32 = vpop.eup %1669 }
 0xb24   :  { %v991_v59 = vpop.permute.xlu1 %990 }
 0xb25   :  { %v993_v60 = vadd.f32 %v991_v59, %v987_v24  ;;  %v1295_v59 = vld [vmem:[#allocation10 + $0x8] sm:$0xff] }
 0xb27   :  { %1671 = vtanh.f32 %v993_v60  ;;  %v1095_v30 = vrot.slane %v993_v60, 7 }
 0xb34   :  { %v1672_v61 = vpop.eup %1671 }
 0xb35   :  { %v2206_v62 = vmul.f32 %v1672_v61, %v1670_v32  ;;  %v1294_v61 = vld [vmem:[#allocation10] sm:$0xff] }
 0xb37   :  { %v997_v63 = vrot.slane %v2206_v62, 5  ;;  %v1235_v44 = vrot.slane %v2206_v62, 3 }
 0xb39   :  { %998 = vrot.lane.b32.xlu0 %v997_v63, %s1857_s20 }
 0xbab   :  { %v999_v50 = vpop.permute.xlu0 %998 }
 0xbac   :  { %1518 = vmatmul.mubr.msk.f32.vlgmr.msra.gmra.mxu0 %vm322_vm1, %v999_v50  ;;  %v1398_v50 = vld [vmem:[#allocation12 + $0x38] sm:$0xff] }
 0xbad   :  { %1569 = vmatprep.subr.mxu1 %v1398_v50 }
 0xc6c   :  { %v1068_v1 = vpop.f32.mrf.mxu0 }
 0xc6d   :  { %v1075_v3 = vrot.slane %v1068_v1, 2  ;;  %v1397_v1 = vld [vmem:[#allocation12 + $0x30] sm:$0xff] }
 0xc6e   :  { %v1070_v5 = vpop.f32.mrf.mxu0 }
 0xc6f   :  { %v1079_v51 = vadd.f32 %v1075_v3, %v2051_v40  ;;  %v1076_v9 = vrot.slane %v1070_v5, 2  ;;  %v1396_v3 = vld [vmem:[#allocation12 + $0x28] sm:$0xff]  ;;  %v1275_v5 = vrot.slane %v2068_v7, 1 }
 0xc71   :  { %v1519_v4 = vmul.f32 -1.442695, %v1079_v51  ;;  %v1080_v16 = vadd.f32 %v1076_v9, %v2125_v2  ;;  %v1267_v51 = vrot.slane %v2100_v55, 3 }
 0xc73   :  { %1673 = vpow2.f32 %v1519_v4  ;;  %v1520_v35 = vmul.f32 -1.442695, %v1080_v16  ;;  %v1395_v4 = vld [vmem:[#allocation12 + $0x20] sm:$0xff] }
 0xc74   :  { %1675 = vtanh.f32 %v1080_v16 }
 0xc80   :  { %v1674_v27 = vpop.eup %1673 }
 0xc81   :  { %v1084_v28 = vadd.f32 1.0, %v1674_v27  ;;  %v1676_v29 = vpop.eup %1675 }
 0xc83   :  { %1677 = vrcp.f32 %v1084_v28 }
 0xc84   :  { %1679 = vpow2.f32 %v1520_v35 }
 0xc90   :  { %v1678_v31 = vpop.eup %1677 }
 0xc91   :  { %v1098_v33 = vmul.f32 %v1678_v31, %v1676_v29  ;;  %v1097_v34 = vmul.f32 %v1678_v31, %v1095_v30  ;;  %v1680_v40 = vpop.eup %1679 }
 0xc92   :  { %v1091_v36 = vadd.f32 1.0, %v1680_v40 }
 0xc93   :  { %1100 = vrot.lane.b32.xlu1 %v1098_v33, %s1857_s20 }
 0xc94   :  { %1681 = vrcp.f32 %v1091_v36 }
 0xca1   :  { %v1682_v2 = vpop.eup %1681 }
 0xd05   :  { %v1101_v38 = vpop.permute.xlu1 %1100 }
 0xd06   :  { %v1103_v42 = vadd.f32 %v1101_v38, %v1097_v34 }
 0xd08   :  { %1683 = vtanh.f32 %v1103_v42  ;;  %v1205_v18 = vrot.slane %v1103_v42, 7 }
 0xd15   :  { %v1684_v43 = vpop.eup %1683 }
 0xd16   :  { %v1105_v45 = vmul.f32 %v1684_v43, %v1682_v2 }
 0xd18   :  { %v1107_v46 = vrot.slane %v1105_v45, 6  ;;  %v1227_v47 = vrot.slane %v1105_v45, 5 }
 0xd1a   :  { %1108 = vrot.lane.b32.xlu0 %v1107_v46, %s1857_s20 }
 0xd1e   :  { %1228 = vrot.lane.b32.xlu0 %v1227_v47, %s1857_s20 }
 0xd22   :  { %1236 = vrot.lane.b32.xlu0 %v1235_v44, %s1857_s20 }
 0xd26   :  { %1244 = vrot.lane.b32.xlu0 %v1243_v48, %s1857_s20 }
 0xd2a   :  { %1252 = vrot.lane.b32.xlu0 %v1251_v49, %s1857_s20 }
 0xd2e   :  { %1260 = vrot.lane.b32.xlu0 %v1259_v52, %s1857_s20 }
 0xd8c   :  { %v1109_v54 = vpop.permute.xlu0 %1108 }
 0xd8d   :  { %1521 = vmatmul.mubr.msk.f32.vlgmr.msra.gmra.mxu1 %vm322_vm1, %v1109_v54 }
 0xd8e   :  { %1570 = vmatpush3.msra.mxu1 %v1398_v50 }
 0xd8f   :  { %1571 = vmatprep.subr.mxu1 %v1397_v1 }
 0xd90   :  { %1572 = vmatpush3.msra.mxu1 %v1397_v1  ;;  %v1229_v9 = vpop.permute.xlu0 %1228 }
 0xd91   :  { %1573 = vmatprep.subr.mxu1 %v1396_v3 }
 0xd92   :  { %1574 = vmatpush3.msra.mxu1 %v1396_v3 }
 0xd93   :  { %1575 = vmatprep.subr.mxu1 %v1395_v4 }
 0xd94   :  { %1576 = vmatpush3.msra.mxu1 %v1395_v4  ;;  %v1237_v27 = vpop.permute.xlu0 %1236 }
 0xd98   :  { %v1245_v29 = vpop.permute.xlu0 %1244 }
 0xd9c   :  { %v1253_v31 = vpop.permute.xlu0 %1252 }
 0xda0   :  { %v1261_v33 = vpop.permute.xlu0 %1260 }
 0xe4d   :  { %v1178_v56 = vpop.f32.mrf.mxu1 }
 0xe4e   :  { %v1185_v58 = vrot.slane %v1178_v56, 1 }
 0xe4f   :  { %v1180_v11 = vpop.f32.mrf.mxu1 }
 0xe50   :  { %v1189_v10 = vadd.f32 %v1185_v58, %v2053_v41  ;;  %v1186_v12 = vrot.slane %v1180_v11, 1  ;;  %v1301_v41 = vld [vmem:[#allocation10 + $0x38] sm:$0xff]  ;;  %v1393_v11 = vld [vmem:[#allocation12 + $0x10] sm:$0xff] }
 0xe51   :  { %1550 = vmatprep.subr.mxu0 %v1301_v41 }
 0xe52   :  { %v1522_v0 = vmul.f32 -1.442695, %v1189_v10  ;;  %v1190_v13 = vadd.f32 %v1186_v12, %v2154_v53  ;;  %v1300_v53 = vld [vmem:[#allocation10 + $0x30] sm:$0xff]  ;;  %1551 = vmatpush3.msra.mxu0 %v1301_v41  ;;  %v1392_v12 = vld [vmem:[#allocation12 + $0x8] sm:$0xff] }
 0xe53   :  { %1552 = vmatprep.subr.mxu0 %v1300_v53  ;;  %v1527_v41 = vld [vmem:[%s2280_s10] ss:$0 sm:$0xff] }
 0xe54   :  { %1685 = vpow2.f32 %v1522_v0  ;;  %1553 = vmatpush3.msra.mxu0 %v1300_v53  ;;  %v1523_v22 = vmul.f32 -1.442695, %v1190_v13  ;;  %v1394_v0 = vld [vmem:[#allocation12 + $0x18] sm:$0xff] }
 0xe55   :  { %1687 = vtanh.f32 %v1190_v13  ;;  %1554 = vmatprep.subr.mxu0 %v1299_v25  ;;  %1577 = vmatprep.subr.mxu1 %v1394_v0  ;;  %v1391_v13 = vld [vmem:[#allocation12] sm:$0xff] }
 0xe56   :  { %1555 = vmatpush3.msra.mxu0 %v1299_v25  ;;  %1578 = vmatpush3.msra.mxu1 %v1394_v0 }
 0xe57   :  { %1579 = vmatprep.subr.mxu1 %v1393_v11 }
 0xe58   :  { %1580 = vmatpush3.msra.mxu1 %v1393_v11 }
 0xe59   :  { %1581 = vmatprep.subr.mxu1 %v1392_v12 }
 0xe5a   :  { %1582 = vmatpush3.msra.mxu1 %v1392_v12 }
 0xe5b   :  { %1583 = vmatprep.subr.mxu1 %v1391_v13 }
 0xe5c   :  { %1584 = vmatpush3.msra.mxu1 %v1391_v13 }
 0xe61   :  { %v1686_v14 = vpop.eup %1685 }
 0xe62   :  { %v1194_v15 = vadd.f32 1.0, %v1686_v14  ;;  %v1688_v17 = vpop.eup %1687  ;;  %v1524_v14 = vld [vmem:[%s2278_s8] ss:$0 sm:$0xff] }
 0xe64   :  { %1689 = vrcp.f32 %v1194_v15 }
 0xe65   :  { %1691 = vpow2.f32 %v1523_v22 }
 0xe71   :  { %v1690_v19 = vpop.eup %1689 }
 0xe72   :  { %v1208_v20 = vmul.f32 %v1690_v19, %v1688_v17  ;;  %v1207_v21 = vmul.f32 %v1690_v19, %v1205_v18 }
 0xe74   :  { %1210 = vrot.lane.b32.xlu1 %v1208_v20, %s1857_s20 }
 0xe78   :  { %1224 = vrot.lane.b32.xlu1 %v2100_v55, %s1857_s20 }
 0xe7c   :  { %1232 = vrot.lane.b32.xlu1 %v2129_v37, %s1857_s20  ;;  %v1692_v37 = vpop.eup %1691 }
 0xe7d   :  { %v1201_v23 = vadd.f32 1.0, %v1692_v37 }
 0xe7f   :  { %1693 = vrcp.f32 %v1201_v23 }
 0xe80   :  { %1240 = vrot.lane.b32.xlu1 %v2158_v6, %s1857_s20 }
 0xe84   :  { %1248 = vrot.lane.b32.xlu1 %v2182_v57, %s1857_s20  ;;  %v1298_v57 = vld [vmem:[#allocation10 + $0x20] sm:$0xff] }
 0xe85   :  { %1556 = vmatprep.subr.mxu0 %v1298_v57 }
 0xe86   :  { %1557 = vmatpush3.msra.mxu0 %v1298_v57 }
 0xe87   :  { %1558 = vmatprep.subr.mxu0 %v1297_v26 }
 0xe88   :  { %1256 = vrot.lane.b32.xlu1 %v2206_v62, %s1857_s20  ;;  %1559 = vmatpush3.msra.mxu0 %v1297_v26 }
 0xe89   :  { %1560 = vmatprep.subr.mxu0 %v1296_v39 }
 0xe8a   :  { %1561 = vmatpush3.msra.mxu0 %v1296_v39 }
 0xe8b   :  { %1562 = vmatprep.subr.mxu0 %v1295_v59 }
 0xe8c   :  { %1264 = vrot.lane.b32.xlu1 %v1105_v45, %s1857_s20  ;;  %v1694_v60 = vpop.eup %1693  ;;  %1563 = vmatpush3.msra.mxu0 %v1295_v59 }
 0xe8d   :  { %1564 = vmatprep.subr.mxu0 %v1294_v61 }
 0xe8e   :  { %1565 = vmatpush3.msra.mxu0 %v1294_v61 }
 0xee6   :  { %v1211_v24 = vpop.permute.xlu1 %1210 }
 0xee7   :  { %v1213_v6 = vadd.f32 %v1211_v24, %v1207_v21 }
 0xee9   :  { %1695 = vtanh.f32 %v1213_v6 }
 0xeea   :  { %v1225_v16 = vpop.permute.xlu1 %1224 }
 0xeeb   :  { %v1231_v40 = vsel %vm1222_vm2, %v1225_v16, %v1229_v9 }
 0xeee   :  { %v1233_v28 = vpop.permute.xlu1 %1232 }
 0xeef   :  { %v1239_v36 = vsel %vm1222_vm2, %v1233_v28, %v1237_v27 }
 0xef2   :  { %v1241_v30 = vpop.permute.xlu1 %1240 }
 0xef3   :  { %v1247_v42 = vsel %vm1222_vm2, %v1241_v30, %v1245_v29 }
 0xef6   :  { %v1696_v32 = vpop.eup %1695  ;;  %v1249_v55 = vpop.permute.xlu1 %1248 }
 0xef7   :  { %v1215_v62 = vmul.f32 %v1696_v32, %v1694_v60  ;;  %v1255_v43 = vsel %vm1222_vm2, %v1249_v55, %v1253_v31 }
 0xef9   :  { %1272 = vrot.lane.b32.xlu1 %v1215_v62, %s1857_s20  ;;  %v1218_v63 = vrot.slane %v1215_v62, 7 }
 0xefa   :  { %v1257_v34 = vpop.permute.xlu1 %1256 }
 0xefb   :  { %1219 = vrot.lane.b32.xlu0 %v1218_v63, %s1857_s20  ;;  %v1263_v44 = vsel %vm1222_vm2, %v1257_v34, %v1261_v33 }
 0xefe   :  { %v1265_v45 = vpop.permute.xlu1 %1264 }
 0xeff   :  { %1268 = vrot.lane.b32.xlu0 %v1267_v51, %s1857_s20 }
 0xf03   :  { %1276 = vrot.lane.b32.xlu0 %v1275_v5, %s1857_s20 }
 0xf6b   :  { %v1273_v52 = vpop.permute.xlu1 %1272 }
 0xf6d   :  { %v1220_v35 = vpop.permute.xlu0 %1219 }
 0xf6e   :  { %v1223_v7 = vsel %vm1222_vm2, %v2072_v8, %v1220_v35 }
 0xf6f   :  { %v1281_v38 = vsel %vm1280_vm3, %v1223_v7, %v1231_v40 }
 0xf70   :  { %v1283_v2 = vsel %vm1282_vm4, %v1281_v38, %v1239_v36 }
 0xf71   :  { %v1285_v46 = vsel %vm1284_vm5, %v1283_v2, %v1247_v42  ;;  %v1269_v47 = vpop.permute.xlu0 %1268 }
 0xf72   :  { %v1287_v48 = vsel %vm1286_vm6, %v1285_v46, %v1255_v43  ;;  %v1271_v8 = vsel %vm1222_vm2, %v1265_v45, %v1269_v47 }
 0xf73   :  { %v1289_v49 = vsel %vm1288_vm7, %v1287_v48, %v1263_v44 }
 0xf74   :  { %v1291_v56 = vsel %vm1290_vm8, %v1289_v49, %v1271_v8 }
 0xf75   :  { %v1277_v54 = vpop.permute.xlu0 %1276 }
 0xf76   :  { %v1279_v58 = vsel %vm1222_vm2, %v1273_v52, %v1277_v54 }
 0xf77   :  { %v1293_v10 = vsel %vm1292_vm9, %v1291_v56, %v1279_v58 }
 0xf78   :  { %1566 = vmatprep.mubr.msk.f32.mxu0 %vm322_vm1, %v1293_v10 }
 0xf79   :  { %1567 = vmatmul.mubr.msk.f32.vlgmr.msra.gmra.mxu0 %vm322_vm1, %v1220_v35 }
0x1039   :  { %v1568_v15 = vpop.f32.mrf.mxu0 }
0x103a   :  { %v1386_v17 = vadd.f32 %v1568_v15, %v1524_v14 }
0x103b   :  { %v1380_v18 = vpop.f32.mrf.mxu0 }
0x103c   :  { %v1381_v19 = vadd.f32 %v1524_v14, %v1380_v18  ;;  %v1390_v21 = vmax.f32 %v1386_v17, 0.0 }
0x103e   :  { %v1389_v20 = vmax.f32 %v1381_v19, 0.0 }
0x1040   :  { %1585 = vmatprep.mubr.msk.f32.mxu1 %vm322_vm1, %v1389_v20 }
0x1041   :  { %1586 = vmatmul.mubr.msk.f32.vlgmr.msra.gmra.mxu1 %vm322_vm1, %v1390_v21 }
0x1101   :  { %v1587_v53 = vpop.f32.mrf.mxu1 }
0x1102   :  { %v1484_v22 = vadd.f32 %v1587_v53, %v1527_v41 }
0x1103   :  { %v1478_v37 = vpop.f32.mrf.mxu1 }
0x1104   :  { %1488 = vst [vmem:[%s2281_s11 + $0x8] sm:$0x1] %v1484_v22  ;;  %v1479_v23 = vadd.f32 %v1527_v41, %v1478_v37 }
0x1106   :  { %1487 = vst [vmem:[%s2281_s11] sm:$0xff] %v1479_v23 }
0x1107   :  { %1493 = vsyncpa [#allocation3], 1 }
0x1108   :  { %1494 = vsyncpa [#allocation5], 1 }
0x1109   :  { %1495 = vsyncpa [#allocation8], 1 }
0x110a   :  { %1496 = vsyncpa [#allocation11], 1 }

</bundles_post_ra>
